<compile_context>
chip_gen: v7x
topology: tpu7x:2x2x1
jax: 0.10.0
libtpu: 0.0.40
codegen_flags: <defaults>
</compile_context>

<pallas_src>
import functools

import numpy as np
import jax
import jax.numpy as jnp
from jax import lax
from jax.experimental import pallas as pl
from jax.experimental.pallas import tpu as pltpu

BN_EPS = 1e-5


def _bilinear_matrix(out_size: int, in_size: int) -> np.ndarray:
    """Row-interpolation matrix matching F.interpolate(mode='bilinear', align_corners=False)."""
    scale = in_size / out_size
    m = np.zeros((out_size, in_size), np.float32)
    for i in range(out_size):
        src = scale * (i + 0.5) - 0.5
        if src < 0.0:
            src = 0.0
        i0 = int(np.floor(src))
        i1 = min(i0 + 1, in_size - 1)
        w1 = src - i0
        m[i, i0] += 1.0 - w1
        m[i, i1] += w1
    return m


# ----------------------------- Pallas kernel ------------------------------ #
def _net_kernel(params_ref,                       # SMEM (32,) f32 packed parameters
                irp_ref,                          # VMEM (NR+2, WP+2) guarded, zero-padded ir
                fusion_ref, deblur_ref, vis_ref,  # VMEM (N*S, S)
                lbd_ref,                          # VMEM (N*S, NR) block-diag row-interp
                rmt_ref,                          # VMEM (WP, S)   column-interp (transposed)
                mask_ref,                         # VMEM (NR, WP)  interior mask
                out_ref,                          # VMEM (N*S, S)
                slab_ref,                         # VMEM scratch (NR+2, WP+2)
                *, N, H, W, NR, WP):
    mask_v = mask_ref[...]                        # 1 on the N*H*W interior, 0 on borders
    inv_cnt = 1.0 / float(N * H * W)

    def conv3x3(src_ref, w_off, b_off):
        # Hoist the 9 weights out of the tap loop (one SMEM read each).
        w = [params_ref[w_off + t] for t in range(9)]
        acc = None
        for ki in range(3):
            for kj in range(3):
                # Static 2D slice: sublane shift ki, lane shift kj (<= 2 each).
                tap = w[ki * 3 + kj] * src_ref[ki:ki + NR, kj:kj + WP]
                acc = tap if acc is None else acc + tap
        # Border positions are garbage; they are masked out in bn_elu below.
        return acc + params_ref[b_off]

    def bn_elu(a, g_off, b_off):
        # Single-pass train-mode batch-norm statistics over the interior elements.
        am = a * mask_v
        s = jnp.sum(am)
        s2 = jnp.sum(am * a)                      # sum of a^2 over the interior
        mean = s * inv_cnt
        var = s2 * inv_cnt - mean * mean          # biased variance (PyTorch train fwd)
        y = (a - mean) * lax.rsqrt(var + BN_EPS) * params_ref[g_off] + params_ref[b_off]
        y = jnp.where(y > 0, y, jnp.exp(jnp.minimum(y, 0.0)) - 1.0)   # ELU(alpha=1)
        return y * mask_v                         # zero the padded-grid border

    # --- att_block: conv3x3 -> BN -> ELU -> conv3x3 -> BN -> ELU ---
    # Conv #1 reads the wrapper-prepared guarded slab directly (no staging copy).
    y1 = bn_elu(conv3x3(irp_ref, 0, 9), 10, 11)

    # Stage y1 for conv #2: zero-fill once keeps guard ring & borders at 0.
    slab_ref[...] = jnp.zeros(slab_ref.shape, slab_ref.dtype)
    slab_ref[1:1 + NR, 1:1 + WP] = y1
    y2 = bn_elu(conv3x3(slab_ref, 12, 21), 22, 23)

    # --- conv1 (1x1, padding=1) + sigmoid over the padded grid ---
    # y2 border is zero, so the border becomes sigmoid(bias), exactly as PyTorch.
    x2 = jax.nn.sigmoid(params_ref[24] * y2 + params_ref[25])          # (NR, WP)

    # --- separable bilinear resample: two tiny MXU matmuls ---
    tmp = jnp.dot(lbd_ref[...], x2, preferred_element_type=jnp.float32)   # (N*S, WP)
    att = jnp.dot(tmp, rmt_ref[...], preferred_element_type=jnp.float32)  # (N*S, S)

    d = deblur_ref[...]
    v = vis_ref[...]
    f = fusion_ref[...]
    out_ref[...] = jax.nn.sigmoid((d + v) * att + (f + v) * (1.0 - att))


# ------------------------------- wrapper ----------------------------------- #
def net_forward(fusion, deblur, vis, ir, params):
    N, C, H, W = ir.shape
    assert C == 1, "Net is defined for single-channel inputs"
    assert H == W, "Net (like the PyTorch module) assumes square spatial inputs"
    S = W                                  # size = ir.shape[-1] -> output (S, S)
    Hp, Wp = H + 2, W + 2
    NR = N * Hp                            # stacked padded rows (sublane axis)
    WP = Wp                                # padded columns (lane axis)

    # Guard-banded, zero-padded ir: image n's padded grid sits at
    # rows [1 + n*Hp, 1 + (n+1)*Hp), cols [1, 1 + Wp).
    padded = jnp.pad(ir[:, 0], ((0, 0), (1, 1), (1, 1))).reshape(NR, WP)
    irp = jnp.pad(padded, ((1, 1), (1, 1)))                    # (NR+2, WP+2)

    # Separable bilinear-resample matrices (host-precomputed, tiny).
    Lm = _bilinear_matrix(S, Hp)                               # (S, Hp)
    Rm = _bilinear_matrix(S, Wp)                               # (S, Wp)
    lbd = np.zeros((N * S, NR), np.float32)                    # block-diag row interp
    for n in range(N):
        lbd[n * S:(n + 1) * S, n * Hp:(n + 1) * Hp] = Lm
    rmt = np.ascontiguousarray(Rm.T)                           # (Wp, S)

    m = np.zeros((N, Hp, Wp), np.float32)
    m[:, 1:1 + H, 1:1 + W] = 1.0
    mask = m.reshape(NR, WP)

    kernel = functools.partial(_net_kernel, N=N, H=H, W=W, NR=NR, WP=WP)

    out = pl.pallas_call(
        kernel,
        out_shape=jax.ShapeDtypeStruct((N * S, S), jnp.float32),
        in_specs=[pl.BlockSpec(memory_space=pltpu.MemorySpace.SMEM)]
        + [pl.BlockSpec(memory_space=pltpu.MemorySpace.VMEM)] * 7,
        out_specs=pl.BlockSpec(memory_space=pltpu.MemorySpace.VMEM),
        scratch_shapes=[pltpu.VMEM((NR + 2, WP + 2), jnp.float32)],
    )(params, irp,
      fusion[:, 0].reshape(N * S, S),
      deblur[:, 0].reshape(N * S, S),
      vis[:, 0].reshape(N * S, S),
      jnp.asarray(lbd), jnp.asarray(rmt), jnp.asarray(mask))
    return out.reshape(N, 1, S, S)


# ------------------------- pure-JAX reference ------------------------------ #
def net_reference(fusion, deblur, vis, ir, params):
    N, C, H, W = ir.shape
    S = W
    p = params

    def conv3(xp, w9, b):
        acc = jnp.zeros((N, H, W), jnp.float32)
        for ki in range(3):
            for kj in range(3):
                acc = acc + w9[ki * 3 + kj] * xp[:, ki:ki + H, kj:kj + W]
        return acc + b

    def bn_elu(a, g, bt):
        mn = jnp.mean(a)
        vr = jnp.mean((a - mn) ** 2)
        y = (a - mn) * lax.rsqrt(vr + BN_EPS) * g + bt
        return jnp.where(y > 0, y, jnp.exp(jnp.minimum(y, 0.0)) - 1.0)

    xp = jnp.pad(ir[:, 0], ((0, 0), (1, 1), (1, 1)))
    y1 = bn_elu(conv3(xp, p[0:9], p[9]), p[10], p[11])
    y1p = jnp.pad(y1, ((0, 0), (1, 1), (1, 1)))
    y2 = bn_elu(conv3(y1p, p[12:21], p[21]), p[22], p[23])
    x2 = jax.nn.sigmoid(p[24] * jnp.pad(y2, ((0, 0), (1, 1), (1, 1))) + p[25])

    Lm = jnp.asarray(_bilinear_matrix(S, H + 2))
    Rm = jnp.asarray(_bilinear_matrix(S, W + 2))
    att = jnp.einsum('sh,nhw,tw->nst', Lm, x2, Rm)

    f, d, v = fusion[:, 0], deblur[:, 0], vis[:, 0]
    out = jax.nn.sigmoid((d + v) * att + (f + v) * (1 - att))
    return out[:, None]


# ------------------------------ parameters --------------------------------- #
def init_params(key):
    k0, k1, k2 = jax.random.split(key, 3)
    w_a = jax.random.normal(k0, (3, 3), jnp.float32) * (1.0 / 3.0)   # conv3x3 #1
    w_b = jax.random.normal(k1, (3, 3), jnp.float32) * (1.0 / 3.0)   # conv3x3 #2
    w_c = jax.random.normal(k2, (), jnp.float32) * 0.5               # conv1x1
    p = jnp.concatenate([
        w_a.reshape(-1),
        jnp.array([0.05, 1.0, 0.0], jnp.float32),    # conv_a bias, bn1 gamma, bn1 beta
        w_b.reshape(-1),
        jnp.array([-0.05, 1.0, 0.0], jnp.float32),   # conv_b bias, bn2 gamma, bn2 beta
        jnp.array([w_c, 0.1], jnp.float32),          # conv1 weight, conv1 bias
        jnp.zeros((6,), jnp.float32),                # pad to 32
    ])
    return p


if __name__ == "__main__":
    key = jax.random.PRNGKey(0)
    kf, kd, kv, ki, kp = jax.random.split(key, 5)

    N, C, H, W = 2, 1, 16, 16
    fusion = jax.random.normal(kf, (N, C, H, W), jnp.float32)
    deblur = jax.random.normal(kd, (N, C, H, W), jnp.float32)
    vis = jax.random.normal(kv, (N, C, H, W), jnp.float32)
    ir = jax.random.normal(ki, (N, C, H, W), jnp.float32)
    params = init_params(kp)

    out = net_forward(fusion, deblur, vis, ir, params)
    jax.block_until_ready(out)

    ref = net_reference(fusion, deblur, vis, ir, params)
    np.testing.assert_allclose(np.asarray(out), np.asarray(ref), atol=1e-4, rtol=1e-4)

    print("KERNEL_OK")
</pallas_src>

<mosaic_0001>
module attributes {stable_mosaic.version = 11 : i64} {
  func.func @_net_kernel(%arg0: memref<32xf32, #tpu.memory_space<smem>>, %arg1: memref<38x20xf32, #tpu.memory_space<vmem>>, %arg2: memref<32x16xf32, #tpu.memory_space<vmem>>, %arg3: memref<32x16xf32, #tpu.memory_space<vmem>>, %arg4: memref<32x16xf32, #tpu.memory_space<vmem>>, %arg5: memref<32x36xf32, #tpu.memory_space<vmem>>, %arg6: memref<18x16xf32, #tpu.memory_space<vmem>>, %arg7: memref<36x18xf32, #tpu.memory_space<vmem>>, %arg8: memref<32x16xf32, #tpu.memory_space<vmem>>, %arg9: memref<38x20xf32, #tpu.memory_space<vmem>>) attributes {dimension_semantics = [], scalar_prefetch = 0 : i64, scratch_operands = 1 : i64, tpu.core_type = #tpu.core_type<tc>} {
    %c0 = arith.constant 0 : index
    %c0_0 = arith.constant 0 : index
    %0 = vector.load %arg7[%c0, %c0_0] : memref<36x18xf32, #tpu.memory_space<vmem>>, vector<36x18xf32>
    %c0_1 = arith.constant 0 : index
    %1 = memref.load %arg0[%c0_1] : memref<32xf32, #tpu.memory_space<smem>>
    %c1 = arith.constant 1 : index
    %2 = memref.load %arg0[%c1] : memref<32xf32, #tpu.memory_space<smem>>
    %c2 = arith.constant 2 : index
    %3 = memref.load %arg0[%c2] : memref<32xf32, #tpu.memory_space<smem>>
    %c3 = arith.constant 3 : index
    %4 = memref.load %arg0[%c3] : memref<32xf32, #tpu.memory_space<smem>>
    %c4 = arith.constant 4 : index
    %5 = memref.load %arg0[%c4] : memref<32xf32, #tpu.memory_space<smem>>
    %c5 = arith.constant 5 : index
    %6 = memref.load %arg0[%c5] : memref<32xf32, #tpu.memory_space<smem>>
    %c6 = arith.constant 6 : index
    %7 = memref.load %arg0[%c6] : memref<32xf32, #tpu.memory_space<smem>>
    %c7 = arith.constant 7 : index
    %8 = memref.load %arg0[%c7] : memref<32xf32, #tpu.memory_space<smem>>
    %c8 = arith.constant 8 : index
    %9 = memref.load %arg0[%c8] : memref<32xf32, #tpu.memory_space<smem>>
    %c0_2 = arith.constant 0 : index
    %c0_3 = arith.constant 0 : index
    %10 = vector.load %arg1[%c0_2, %c0_3] : memref<38x20xf32, #tpu.memory_space<vmem>>, vector<36x18xf32>
    %11 = vector.broadcast %1 : f32 to vector<36x18xf32>
    %12 = arith.mulf %11, %10 : vector<36x18xf32>
    %c0_4 = arith.constant 0 : index
    %c1_5 = arith.constant 1 : index
    %13 = vector.load %arg1[%c0_4, %c1_5] : memref<38x20xf32, #tpu.memory_space<vmem>>, vector<36x18xf32>
    %14 = vector.broadcast %2 : f32 to vector<36x18xf32>
    %15 = arith.mulf %14, %13 : vector<36x18xf32>
    %16 = arith.addf %12, %15 : vector<36x18xf32>
    %c0_6 = arith.constant 0 : index
    %c2_7 = arith.constant 2 : index
    %17 = vector.load %arg1[%c0_6, %c2_7] : memref<38x20xf32, #tpu.memory_space<vmem>>, vector<36x18xf32>
    %18 = vector.broadcast %3 : f32 to vector<36x18xf32>
    %19 = arith.mulf %18, %17 : vector<36x18xf32>
    %20 = arith.addf %16, %19 : vector<36x18xf32>
    %c1_8 = arith.constant 1 : index
    %c0_9 = arith.constant 0 : index
    %21 = vector.load %arg1[%c1_8, %c0_9] : memref<38x20xf32, #tpu.memory_space<vmem>>, vector<36x18xf32>
    %22 = vector.broadcast %4 : f32 to vector<36x18xf32>
    %23 = arith.mulf %22, %21 : vector<36x18xf32>
    %24 = arith.addf %20, %23 : vector<36x18xf32>
    %c1_10 = arith.constant 1 : index
    %c1_11 = arith.constant 1 : index
    %25 = vector.load %arg1[%c1_10, %c1_11] : memref<38x20xf32, #tpu.memory_space<vmem>>, vector<36x18xf32>
    %26 = vector.broadcast %5 : f32 to vector<36x18xf32>
    %27 = arith.mulf %26, %25 : vector<36x18xf32>
    %28 = arith.addf %24, %27 : vector<36x18xf32>
    %c1_12 = arith.constant 1 : index
    %c2_13 = arith.constant 2 : index
    %29 = vector.load %arg1[%c1_12, %c2_13] : memref<38x20xf32, #tpu.memory_space<vmem>>, vector<36x18xf32>
    %30 = vector.broadcast %6 : f32 to vector<36x18xf32>
    %31 = arith.mulf %30, %29 : vector<36x18xf32>
    %32 = arith.addf %28, %31 : vector<36x18xf32>
    %c2_14 = arith.constant 2 : index
    %c0_15 = arith.constant 0 : index
    %33 = vector.load %arg1[%c2_14, %c0_15] : memref<38x20xf32, #tpu.memory_space<vmem>>, vector<36x18xf32>
    %34 = vector.broadcast %7 : f32 to vector<36x18xf32>
    %35 = arith.mulf %34, %33 : vector<36x18xf32>
    %36 = arith.addf %32, %35 : vector<36x18xf32>
    %c2_16 = arith.constant 2 : index
    %c1_17 = arith.constant 1 : index
    %37 = vector.load %arg1[%c2_16, %c1_17] : memref<38x20xf32, #tpu.memory_space<vmem>>, vector<36x18xf32>
    %38 = vector.broadcast %8 : f32 to vector<36x18xf32>
    %39 = arith.mulf %38, %37 : vector<36x18xf32>
    %40 = arith.addf %36, %39 : vector<36x18xf32>
    %c2_18 = arith.constant 2 : index
    %c2_19 = arith.constant 2 : index
    %41 = vector.load %arg1[%c2_18, %c2_19] : memref<38x20xf32, #tpu.memory_space<vmem>>, vector<36x18xf32>
    %42 = vector.broadcast %9 : f32 to vector<36x18xf32>
    %43 = arith.mulf %42, %41 : vector<36x18xf32>
    %44 = arith.addf %40, %43 : vector<36x18xf32>
    %c9 = arith.constant 9 : index
    %45 = memref.load %arg0[%c9] : memref<32xf32, #tpu.memory_space<smem>>
    %46 = vector.broadcast %45 : f32 to vector<36x18xf32>
    %47 = arith.addf %44, %46 : vector<36x18xf32>
    %48 = arith.mulf %47, %0 : vector<36x18xf32>
    %49 = vector.shape_cast %48 : vector<36x18xf32> to vector<1x36x18xf32>
    %cst = arith.constant dense<0.000000e+00> : vector<1xf32>
    %50 = vector.multi_reduction <add>, %49, %cst [1, 2] : vector<1x36x18xf32> to vector<1xf32>
    %51 = vector.shape_cast %50 : vector<1xf32> to vector<1x1x1xf32>
    %52 = vector.extract %51[0, 0, 0] : f32 from vector<1x1x1xf32>
    %53 = arith.mulf %48, %47 : vector<36x18xf32>
    %54 = vector.shape_cast %53 : vector<36x18xf32> to vector<1x36x18xf32>
    %cst_20 = arith.constant dense<0.000000e+00> : vector<1xf32>
    %55 = vector.multi_reduction <add>, %54, %cst_20 [1, 2] : vector<1x36x18xf32> to vector<1xf32>
    %56 = vector.shape_cast %55 : vector<1xf32> to vector<1x1x1xf32>
    %57 = vector.extract %56[0, 0, 0] : f32 from vector<1x1x1xf32>
    %cst_21 = arith.constant 0.001953125 : f32
    %58 = arith.mulf %52, %cst_21 : f32
    %cst_22 = arith.constant 0.001953125 : f32
    %59 = arith.mulf %57, %cst_22 : f32
    %60 = arith.mulf %58, %58 : f32
    %61 = arith.subf %59, %60 : f32
    %62 = vector.broadcast %58 : f32 to vector<36x18xf32>
    %63 = arith.subf %47, %62 : vector<36x18xf32>
    %cst_23 = arith.constant 9.99999974E-6 : f32
    %64 = arith.addf %61, %cst_23 : f32
    %65 = math.rsqrt %64 : f32
    %66 = vector.broadcast %65 : f32 to vector<36x18xf32>
    %67 = arith.mulf %63, %66 : vector<36x18xf32>
    %c10 = arith.constant 10 : index
    %68 = memref.load %arg0[%c10] : memref<32xf32, #tpu.memory_space<smem>>
    %69 = vector.broadcast %68 : f32 to vector<36x18xf32>
    %70 = arith.mulf %67, %69 : vector<36x18xf32>
    %c11 = arith.constant 11 : index
    %71 = memref.load %arg0[%c11] : memref<32xf32, #tpu.memory_space<smem>>
    %72 = vector.broadcast %71 : f32 to vector<36x18xf32>
    %73 = arith.addf %70, %72 : vector<36x18xf32>
    %cst_24 = arith.constant 0.000000e+00 : f32
    %74 = vector.broadcast %cst_24 : f32 to vector<36x18xf32>
    %75 = arith.cmpf ogt, %73, %74 : vector<36x18xf32>
    %cst_25 = arith.constant 0.000000e+00 : f32
    %76 = vector.broadcast %cst_25 : f32 to vector<36x18xf32>
    %77 = arith.minimumf %73, %76 : vector<36x18xf32>
    %78 = math.exp %77 : vector<36x18xf32>
    %cst_26 = arith.constant 1.000000e+00 : f32
    %79 = vector.broadcast %cst_26 : f32 to vector<36x18xf32>
    %80 = arith.subf %78, %79 : vector<36x18xf32>
    %81 = arith.select %75, %73, %80 : vector<36x18xi1>, vector<36x18xf32>
    %82 = arith.mulf %81, %0 : vector<36x18xf32>
    %cst_27 = arith.constant 0.000000e+00 : f32
    %83 = vector.broadcast %cst_27 : f32 to vector<38x20xf32>
    %c0_28 = arith.constant 0 : index
    %c0_29 = arith.constant 0 : index
    %84 = vector.load %arg9[%c0_28, %c0_29] : memref<38x20xf32, #tpu.memory_space<vmem>>, vector<38x20xf32>
    tpu.vector_store %arg9[%c0_28, %c0_29], %83 {strides = array<i32>} : memref<38x20xf32, #tpu.memory_space<vmem>>, vector<38x20xf32>,
    %c1_30 = arith.constant 1 : index
    %c1_31 = arith.constant 1 : index
    %85 = vector.load %arg9[%c1_30, %c1_31] : memref<38x20xf32, #tpu.memory_space<vmem>>, vector<36x18xf32>
    tpu.vector_store %arg9[%c1_30, %c1_31], %82 {strides = array<i32>} : memref<38x20xf32, #tpu.memory_space<vmem>>, vector<36x18xf32>,
    %c12 = arith.constant 12 : index
    %86 = memref.load %arg0[%c12] : memref<32xf32, #tpu.memory_space<smem>>
    %c13 = arith.constant 13 : index
    %87 = memref.load %arg0[%c13] : memref<32xf32, #tpu.memory_space<smem>>
    %c14 = arith.constant 14 : index
    %88 = memref.load %arg0[%c14] : memref<32xf32, #tpu.memory_space<smem>>
    %c15 = arith.constant 15 : index
    %89 = memref.load %arg0[%c15] : memref<32xf32, #tpu.memory_space<smem>>
    %c16 = arith.constant 16 : index
    %90 = memref.load %arg0[%c16] : memref<32xf32, #tpu.memory_space<smem>>
    %c17 = arith.constant 17 : index
    %91 = memref.load %arg0[%c17] : memref<32xf32, #tpu.memory_space<smem>>
    %c18 = arith.constant 18 : index
    %92 = memref.load %arg0[%c18] : memref<32xf32, #tpu.memory_space<smem>>
    %c19 = arith.constant 19 : index
    %93 = memref.load %arg0[%c19] : memref<32xf32, #tpu.memory_space<smem>>
    %c20 = arith.constant 20 : index
    %94 = memref.load %arg0[%c20] : memref<32xf32, #tpu.memory_space<smem>>
    %c0_32 = arith.constant 0 : index
    %c0_33 = arith.constant 0 : index
    %95 = vector.load %arg9[%c0_32, %c0_33] : memref<38x20xf32, #tpu.memory_space<vmem>>, vector<36x18xf32>
    %96 = vector.broadcast %86 : f32 to vector<36x18xf32>
    %97 = arith.mulf %96, %95 : vector<36x18xf32>
    %c0_34 = arith.constant 0 : index
    %c1_35 = arith.constant 1 : index
    %98 = vector.load %arg9[%c0_34, %c1_35] : memref<38x20xf32, #tpu.memory_space<vmem>>, vector<36x18xf32>
    %99 = vector.broadcast %87 : f32 to vector<36x18xf32>
    %100 = arith.mulf %99, %98 : vector<36x18xf32>
    %101 = arith.addf %97, %100 : vector<36x18xf32>
    %c0_36 = arith.constant 0 : index
    %c2_37 = arith.constant 2 : index
    %102 = vector.load %arg9[%c0_36, %c2_37] : memref<38x20xf32, #tpu.memory_space<vmem>>, vector<36x18xf32>
    %103 = vector.broadcast %88 : f32 to vector<36x18xf32>
    %104 = arith.mulf %103, %102 : vector<36x18xf32>
    %105 = arith.addf %101, %104 : vector<36x18xf32>
    %c1_38 = arith.constant 1 : index
    %c0_39 = arith.constant 0 : index
    %106 = vector.load %arg9[%c1_38, %c0_39] : memref<38x20xf32, #tpu.memory_space<vmem>>, vector<36x18xf32>
    %107 = vector.broadcast %89 : f32 to vector<36x18xf32>
    %108 = arith.mulf %107, %106 : vector<36x18xf32>
    %109 = arith.addf %105, %108 : vector<36x18xf32>
    %c1_40 = arith.constant 1 : index
    %c1_41 = arith.constant 1 : index
    %110 = vector.load %arg9[%c1_40, %c1_41] : memref<38x20xf32, #tpu.memory_space<vmem>>, vector<36x18xf32>
    %111 = vector.broadcast %90 : f32 to vector<36x18xf32>
    %112 = arith.mulf %111, %110 : vector<36x18xf32>
    %113 = arith.addf %109, %112 : vector<36x18xf32>
    %c1_42 = arith.constant 1 : index
    %c2_43 = arith.constant 2 : index
    %114 = vector.load %arg9[%c1_42, %c2_43] : memref<38x20xf32, #tpu.memory_space<vmem>>, vector<36x18xf32>
    %115 = vector.broadcast %91 : f32 to vector<36x18xf32>
    %116 = arith.mulf %115, %114 : vector<36x18xf32>
    %117 = arith.addf %113, %116 : vector<36x18xf32>
    %c2_44 = arith.constant 2 : index
    %c0_45 = arith.constant 0 : index
    %118 = vector.load %arg9[%c2_44, %c0_45] : memref<38x20xf32, #tpu.memory_space<vmem>>, vector<36x18xf32>
    %119 = vector.broadcast %92 : f32 to vector<36x18xf32>
    %120 = arith.mulf %119, %118 : vector<36x18xf32>
    %121 = arith.addf %117, %120 : vector<36x18xf32>
    %c2_46 = arith.constant 2 : index
    %c1_47 = arith.constant 1 : index
    %122 = vector.load %arg9[%c2_46, %c1_47] : memref<38x20xf32, #tpu.memory_space<vmem>>, vector<36x18xf32>
    %123 = vector.broadcast %93 : f32 to vector<36x18xf32>
    %124 = arith.mulf %123, %122 : vector<36x18xf32>
    %125 = arith.addf %121, %124 : vector<36x18xf32>
    %c2_48 = arith.constant 2 : index
    %c2_49 = arith.constant 2 : index
    %126 = vector.load %arg9[%c2_48, %c2_49] : memref<38x20xf32, #tpu.memory_space<vmem>>, vector<36x18xf32>
    %127 = vector.broadcast %94 : f32 to vector<36x18xf32>
    %128 = arith.mulf %127, %126 : vector<36x18xf32>
    %129 = arith.addf %125, %128 : vector<36x18xf32>
    %c21 = arith.constant 21 : index
    %130 = memref.load %arg0[%c21] : memref<32xf32, #tpu.memory_space<smem>>
    %131 = vector.broadcast %130 : f32 to vector<36x18xf32>
    %132 = arith.addf %129, %131 : vector<36x18xf32>
    %133 = arith.mulf %132, %0 : vector<36x18xf32>
    %134 = vector.shape_cast %133 : vector<36x18xf32> to vector<1x36x18xf32>
    %cst_50 = arith.constant dense<0.000000e+00> : vector<1xf32>
    %135 = vector.multi_reduction <add>, %134, %cst_50 [1, 2] : vector<1x36x18xf32> to vector<1xf32>
    %136 = vector.shape_cast %135 : vector<1xf32> to vector<1x1x1xf32>
    %137 = vector.extract %136[0, 0, 0] : f32 from vector<1x1x1xf32>
    %138 = arith.mulf %133, %132 : vector<36x18xf32>
    %139 = vector.shape_cast %138 : vector<36x18xf32> to vector<1x36x18xf32>
    %cst_51 = arith.constant dense<0.000000e+00> : vector<1xf32>
    %140 = vector.multi_reduction <add>, %139, %cst_51 [1, 2] : vector<1x36x18xf32> to vector<1xf32>
    %141 = vector.shape_cast %140 : vector<1xf32> to vector<1x1x1xf32>
    %142 = vector.extract %141[0, 0, 0] : f32 from vector<1x1x1xf32>
    %cst_52 = arith.constant 0.001953125 : f32
    %143 = arith.mulf %137, %cst_52 : f32
    %cst_53 = arith.constant 0.001953125 : f32
    %144 = arith.mulf %142, %cst_53 : f32
    %145 = arith.mulf %143, %143 : f32
    %146 = arith.subf %144, %145 : f32
    %147 = vector.broadcast %143 : f32 to vector<36x18xf32>
    %148 = arith.subf %132, %147 : vector<36x18xf32>
    %cst_54 = arith.constant 9.99999974E-6 : f32
    %149 = arith.addf %146, %cst_54 : f32
    %150 = math.rsqrt %149 : f32
    %151 = vector.broadcast %150 : f32 to vector<36x18xf32>
    %152 = arith.mulf %148, %151 : vector<36x18xf32>
    %c22 = arith.constant 22 : index
    %153 = memref.load %arg0[%c22] : memref<32xf32, #tpu.memory_space<smem>>
    %154 = vector.broadcast %153 : f32 to vector<36x18xf32>
    %155 = arith.mulf %152, %154 : vector<36x18xf32>
    %c23 = arith.constant 23 : index
    %156 = memref.load %arg0[%c23] : memref<32xf32, #tpu.memory_space<smem>>
    %157 = vector.broadcast %156 : f32 to vector<36x18xf32>
    %158 = arith.addf %155, %157 : vector<36x18xf32>
    %cst_55 = arith.constant 0.000000e+00 : f32
    %159 = vector.broadcast %cst_55 : f32 to vector<36x18xf32>
    %160 = arith.cmpf ogt, %158, %159 : vector<36x18xf32>
    %cst_56 = arith.constant 0.000000e+00 : f32
    %161 = vector.broadcast %cst_56 : f32 to vector<36x18xf32>
    %162 = arith.minimumf %158, %161 : vector<36x18xf32>
    %163 = math.exp %162 : vector<36x18xf32>
    %cst_57 = arith.constant 1.000000e+00 : f32
    %164 = vector.broadcast %cst_57 : f32 to vector<36x18xf32>
    %165 = arith.subf %163, %164 : vector<36x18xf32>
    %166 = arith.select %160, %158, %165 : vector<36x18xi1>, vector<36x18xf32>
    %167 = arith.mulf %166, %0 : vector<36x18xf32>
    %c24 = arith.constant 24 : index
    %168 = memref.load %arg0[%c24] : memref<32xf32, #tpu.memory_space<smem>>
    %169 = vector.broadcast %168 : f32 to vector<36x18xf32>
    %170 = arith.mulf %169, %167 : vector<36x18xf32>
    %c25 = arith.constant 25 : index
    %171 = memref.load %arg0[%c25] : memref<32xf32, #tpu.memory_space<smem>>
    %172 = vector.broadcast %171 : f32 to vector<36x18xf32>
    %173 = arith.addf %170, %172 : vector<36x18xf32>
    %174 = arith.negf %173 : vector<36x18xf32>
    %175 = math.exp %174 : vector<36x18xf32>
    %cst_58 = arith.constant 1.000000e+00 : f32
    %176 = vector.broadcast %cst_58 : f32 to vector<36x18xf32>
    %177 = arith.addf %176, %175 : vector<36x18xf32>
    %178 = arith.divf %176, %177 : vector<36x18xf32>
    %c0_59 = arith.constant 0 : index
    %c0_60 = arith.constant 0 : index
    %179 = vector.load %arg5[%c0_59, %c0_60] : memref<32x36xf32, #tpu.memory_space<vmem>>, vector<32x36xf32>
    %cst_61 = arith.constant dense<0.000000e+00> : vector<32x18xf32>
    %180 = tpu.matmul %179, %178, %cst_61 {dimension_numbers = #tpu.dot_dimension_numbers<[1], [0], [0], [1], [0, 0, 1, 1], [], []>} : vector<32x36xf32>, vector<36x18xf32>, vector<32x18xf32> -> vector<32x18xf32>
    %c0_62 = arith.constant 0 : index
    %c0_63 = arith.constant 0 : index
    %181 = vector.load %arg6[%c0_62, %c0_63] : memref<18x16xf32, #tpu.memory_space<vmem>>, vector<18x16xf32>
    %cst_64 = arith.constant dense<0.000000e+00> : vector<32x16xf32>
    %182 = tpu.matmul %180, %181, %cst_64 {dimension_numbers = #tpu.dot_dimension_numbers<[1], [0], [0], [1], [0, 0, 1, 1], [], []>} : vector<32x18xf32>, vector<18x16xf32>, vector<32x16xf32> -> vector<32x16xf32>
    %c0_65 = arith.constant 0 : index
    %c0_66 = arith.constant 0 : index
    %183 = vector.load %arg3[%c0_65, %c0_66] : memref<32x16xf32, #tpu.memory_space<vmem>>, vector<32x16xf32>
    %c0_67 = arith.constant 0 : index
    %c0_68 = arith.constant 0 : index
    %184 = vector.load %arg4[%c0_67, %c0_68] : memref<32x16xf32, #tpu.memory_space<vmem>>, vector<32x16xf32>
    %c0_69 = arith.constant 0 : index
    %c0_70 = arith.constant 0 : index
    %185 = vector.load %arg2[%c0_69, %c0_70] : memref<32x16xf32, #tpu.memory_space<vmem>>, vector<32x16xf32>
    %186 = arith.addf %183, %184 : vector<32x16xf32>
    %187 = arith.mulf %186, %182 : vector<32x16xf32>
    %188 = arith.addf %185, %184 : vector<32x16xf32>
    %cst_71 = arith.constant 1.000000e+00 : f32
    %189 = vector.broadcast %cst_71 : f32 to vector<32x16xf32>
    %190 = arith.subf %189, %182 : vector<32x16xf32>
    %191 = arith.mulf %188, %190 : vector<32x16xf32>
    %192 = arith.addf %187, %191 : vector<32x16xf32>
    %193 = arith.negf %192 : vector<32x16xf32>
    %194 = math.exp %193 : vector<32x16xf32>
    %cst_72 = arith.constant 1.000000e+00 : f32
    %195 = vector.broadcast %cst_72 : f32 to vector<32x16xf32>
    %196 = arith.addf %195, %194 : vector<32x16xf32>
    %197 = arith.divf %195, %196 : vector<32x16xf32>
    %c0_73 = arith.constant 0 : index
    %c0_74 = arith.constant 0 : index
    %198 = vector.load %arg8[%c0_73, %c0_74] : memref<32x16xf32, #tpu.memory_space<vmem>>, vector<32x16xf32>
    tpu.vector_store %arg8[%c0_73, %c0_74], %197 {strides = array<i32>} : memref<32x16xf32, #tpu.memory_space<vmem>>, vector<32x16xf32>,
    return
  }
}

</mosaic_0001>

<bundles_post_ra>
// kernel: tpu_custom_call.1
= control target key start
LH: loop header
LB: loop body
LE: loop exit
PB: predicated region body
PF: predicated region fallthrough
CT: control target
= control target key end

     0   :  { %13 = vsyncpa [#allocation4], 0  ;;  %s1828_s0 = inlined_call_operand.vmem [shape: f32[32], index: 0, kind: input, shape index: {}]   ;;  %s1829_s1 = inlined_call_operand.vmem [shape: f32[38,20], index: 1, kind: input, shape index: {}]   ;;  %s1830_s2 = inlined_call_operand.vmem [shape: f32[32,16], index: 2, kind: input, shape index: {}]   ;;  %s1831_s3 = inlined_call_operand.vmem [shape: f32[32,16], index: 3, kind: input, shape index: {}]   ;;  %s1832_s4 = inlined_call_operand.vmem [shape: f32[32,16], index: 4, kind: input, shape index: {}]   ;;  %s1833_s5 = inlined_call_operand.vmem [shape: f32[32,36], index: 5, kind: input, shape index: {}]   ;;  %s1834_s6 = inlined_call_operand.vmem [shape: f32[18,16], index: 6, kind: input, shape index: {}]   ;;  %s1835_s7 = inlined_call_operand.vmem [shape: f32[36,18], index: 7, kind: input, shape index: {}]   ;;  %s1836_s8 = inlined_call_operand.vmem [shape: f32[32,16], index: 8, kind: output, shape index: {}]  }
   0x1   :  { %s20_s29 = sshll.u32 %s1828_s0, 4  ;;  %s21_s29 = int_to_ptr.vmem [resolvable:$true] %s20_s29 }
   0x2   :  { %s1314_s30 = scalar_lea.vmem %s21_s29, 16  ;;  %p1319_p1 = scmp.lt.s32.totalorder %s21_s29, %s21_s29 }
   0x3   :  { %p1315_p0 = scmp.ne.s32.totalorder %s21_s29, %s1314_s30  ;;  %p1320_p2 = scmp.lt.s32.totalorder %s1314_s30, %s1314_s30 }
   0x5   :  { %p1321_p3 = por %p1320_p2, %p1319_p1 }
   0x7   :  { %p1322_p4 = pnand %p1321_p3, %p1315_p0 }
   0x9   :  { %1325 = shalt.err (!%p1322_p4)
}
   0xa   :  { %s1328_s9 = smov [#allocation3]  }
   0xb   :  { %23 = dma.vmem_to_smem %s21_s29, 16, %s1328_s9, [#allocation4]  }
   0xc   :  { %1326 = dma.done.wait [#allocation4], 16  }
   0xd   :  { %1327 = vsyncadd [#allocation4], 4294967280 }
   0xe   :  { %41 = sfence }
   0xf   :  { %s1127_s10 = sld [smem:[#allocation3 + $0x1]]  ;;  %s1128_s11 = sld [smem:[#allocation3 + $0x2]]  ;;  %v1384_v0 = vld [vmem:[%s1829_s1 + $0x10] sm:$0xff]  ;;  %v1389_v1 = vld [vmem:[%s1829_s1] sm:$0xff]  ;;  %v1394_v3 = vld [vmem:[%s1829_s1 + $0x8] sm:$0xff]  ;;  %vm297_vm0 = vcmask 146432  }
  0x10   :  { %s1329_s17 = smov 127   ;;  %v1405_v9 = vld [vmem:[%s1829_s1 + $0x18] sm:$0xff]  ;;  %s1130_s20 = sld [smem:[#allocation3 + $0x4]]  ;;  %v1414_v12 = vld [vmem:[%s1829_s1 + $0x20] sm:$0xf]  ;;  %v1432_v19 = vld [vmem:[%s1829_s1 + $0x9] sm:$0xff] }
  0x11   :  { %s1330_s21 = smov 126   ;;  %v1423_v15 = vld [vmem:[%s1829_s1 + $0x1] sm:$0xff]  ;;  %s1131_s26 = sld [smem:[#allocation3 + $0x5]]  ;;  %v1441_v23 = vld [vmem:[%s1829_s1 + $0x11] sm:$0xff]  ;;  %v1450_v26 = vld [vmem:[%s1829_s1 + $0x19] sm:$0xff]  ;;  %vm305_vm1 = vcmask 142336  }
  0x12   :  { %v1459_v29 = vld [vmem:[%s1829_s1 + $0x21] sm:$0xf]  ;;  %s1134_s15 = sld [smem:[#allocation3 + $0x8]]  ;;  %v1477_v36 = vld [vmem:[%s1829_s1 + $0xa] sm:$0xff]  ;;  %v1486_v40 = vld [vmem:[%s1829_s1 + $0x12] sm:$0xff]  ;;  %s1132_s27 = sld [smem:[#allocation3 + $0x6]] }
  0x13   :  { %v1468_v32 = vld [vmem:[%s1829_s1 + $0x2] sm:$0xff]  ;;  %v1495_v43 = vld [vmem:[%s1829_s1 + $0x1a] sm:$0xff]  ;;  %s1135_s28 = sld [smem:[#allocation3 + $0x9]]  ;;  %vm409_vm2 = vcmask 162816   ;;  %s1136_s24 = sld [smem:[#allocation3 + $0xa]]  ;;  %vm414_vm3 = vcmask 160768  }
  0x14   :  { %v1504_v46 = vld [vmem:[%s1829_s1 + $0x22] sm:$0xf]  ;;  %s47_s1 = sld [smem:[#allocation3]]  ;;  %s1137_s25 = sld [smem:[#allocation3 + $0xb]]  ;;  %vm436_vm9 = vcmask 154632   ;;  %vm441_vm10 = vcmask 150536  }
  0x15   :  { %v67_v2 = vstv %s1127_s10  ;;  %v98_v6 = vstv %s1128_s11  ;;  %s1133_s11 = sld [smem:[#allocation3 + $0x7]]  ;;  %s1147_s29 = sld [smem:[#allocation3 + $0x10]]  ;;  %vm851_vm11 = vcmask 293888  }
  0x16   :  { %v70_v4 = vmul.f32 %v67_v2, %v1384_v0  ;;  %v68_v5 = vmul.f32 %v67_v2, %v1389_v1  ;;  %v99_v7 = vmul.f32 %v98_v6, %v1389_v1  ;;  %v69_v8 = vmul.f32 %v67_v2, %v1394_v3  ;;  %s1148_s30 = sld [smem:[#allocation3 + $0x11]]  ;;  %s1150_s9 = sld [smem:[#allocation3 + $0x13]] }
  0x17   :  { %v71_v10 = vmul.f32 %v67_v2, %v1405_v9  ;;  %v100_v11 = vmul.f32 %v98_v6, %v1394_v3  ;;  %v72_v13 = vmul.f32 %v67_v2, %v1414_v12  ;;  %v101_v14 = vmul.f32 %v98_v6, %v1384_v0  ;;  %s1151_s10 = sld [smem:[#allocation3 + $0x14]]  ;;  %s1146_s12 = sld [smem:[#allocation3 + $0xf]] }
  0x18   :  { %82 = vrot.lane.b32.xlu1 %v70_v4, %s1329_s17  ;;  %78 = vrot.lane.b32.xlu0 %v68_v5, %s1329_s17  ;;  %v145_v16 = vstv %s1130_s20  ;;  %v102_v18 = vmul.f32 %v98_v6, %v1405_v9  ;;  %v103_v20 = vmul.f32 %v98_v6, %v1414_v12  ;;  %v176_v22 = vstv %s1131_s26  ;;  %s1129_s26 = sld [smem:[#allocation3 + $0x3]] }
  0x19   :  { %v146_v17 = vmul.f32 %v145_v16, %v1423_v15  ;;  %v147_v21 = vmul.f32 %v145_v16, %v1432_v19  ;;  %v177_v24 = vmul.f32 %v176_v22, %v1423_v15  ;;  %v148_v25 = vmul.f32 %v145_v16, %v1441_v23 }
  0x1a   :  { %v149_v27 = vmul.f32 %v145_v16, %v1450_v26  ;;  %v178_v28 = vmul.f32 %v176_v22, %v1432_v19  ;;  %v150_v30 = vmul.f32 %v145_v16, %v1459_v29  ;;  %v179_v31 = vmul.f32 %v176_v22, %v1441_v23 }
  0x1b   :  { %v223_v33 = vstv %s1133_s11  ;;  %v180_v35 = vmul.f32 %v176_v22, %v1450_v26  ;;  %v181_v37 = vmul.f32 %v176_v22, %v1459_v29  ;;  %v254_v39 = vstv %s1134_s15  ;;  %s1143_s11 = sld [smem:[#allocation3 + $0xc]] }
  0x1c   :  { %109 = vrot.lane.b32.xlu1 %v99_v7, %s1330_s21  ;;  %80 = vrot.lane.b32.xlu0 %v69_v8, %s1329_s17  ;;  %v224_v34 = vmul.f32 %v223_v33, %v1468_v32  ;;  %v225_v38 = vmul.f32 %v223_v33, %v1477_v36  ;;  %v255_v41 = vmul.f32 %v254_v39, %v1468_v32  ;;  %v61_v51 = vstv %s47_s1 }
  0x1d   :  { %v226_v42 = vmul.f32 %v223_v33, %v1486_v40  ;;  %v227_v44 = vmul.f32 %v223_v33, %v1495_v43  ;;  %v256_v45 = vmul.f32 %v254_v39, %v1477_v36  ;;  %v228_v47 = vmul.f32 %v223_v33, %v1504_v46 }
  0x1e   :  { %v257_v48 = vmul.f32 %v254_v39, %v1486_v40  ;;  %v259_v49 = vmul.f32 %v254_v39, %v1504_v46  ;;  %v258_v50 = vmul.f32 %v254_v39, %v1495_v43  ;;  %v62_v52 = vmul.f32 %v61_v51, %v1389_v1 }
  0x1f   :  { %v134_v55 = vstv %s1129_s26  ;;  %v63_v57 = vmul.f32 %v61_v51, %v1394_v3  ;;  %v64_v62 = vmul.f32 %v61_v51, %v1384_v0  ;;  %v65_v8 = vmul.f32 %v61_v51, %v1405_v9  ;;  %s1332_s26 = smov 1  }
  0x20   :  { %84 = vrot.lane.b32.xlu1 %v71_v10, %s1329_s17  ;;  %111 = vrot.lane.b32.xlu0 %v100_v11, %s1330_s21  ;;  %v135_v58 = vmul.f32 %v134_v55, %v1423_v15  ;;  %v136_v4 = vmul.f32 %v134_v55, %v1432_v19  ;;  %v137_v3 = vmul.f32 %v134_v55, %v1441_v23  ;;  %v212_v23 = vstv %s1132_s27  ;;  %s1144_s27 = sld [smem:[#allocation3 + $0xd]] }
  0x21   :  { %v66_v0 = vmul.f32 %v61_v51, %v1414_v12  ;;  %v139_v9 = vmul.f32 %v134_v55, %v1459_v29 }
  0x24   :  { %86 = vrot.lane.b32.xlu1 %v72_v13, %s1329_s17  ;;  %113 = vrot.lane.b32.xlu0 %v101_v14, %s1330_s21 }
  0x28   :  { %156 = vrot.lane.b32.xlu1 %v146_v17, %s1329_s17  ;;  %115 = vrot.lane.b32.xlu0 %v102_v18, %s1330_s21  ;;  %v138_v17 = vmul.f32 %v134_v55, %v1450_v26  ;;  %v217_v55 = vmul.f32 %v212_v23, %v1504_v46 }
  0x2c   :  { %117 = vrot.lane.b32.xlu1 %v103_v20, %s1330_s21  ;;  %158 = vrot.lane.b32.xlu0 %v147_v21, %s1329_s17 }
  0x30   :  { %187 = vrot.lane.b32.xlu1 %v177_v24, %s1330_s21  ;;  %160 = vrot.lane.b32.xlu0 %v148_v25, %s1329_s17 }
  0x34   :  { %162 = vrot.lane.b32.xlu1 %v149_v27, %s1329_s17  ;;  %189 = vrot.lane.b32.xlu0 %v178_v28, %s1330_s21 }
  0x38   :  { %164 = vrot.lane.b32.xlu1 %v150_v30, %s1329_s17  ;;  %191 = vrot.lane.b32.xlu0 %v179_v31, %s1330_s21  ;;  %v213_v31 = vmul.f32 %v212_v23, %v1468_v32  ;;  %v216_v32 = vmul.f32 %v212_v23, %v1495_v43 }
  0x3c   :  { %234 = vrot.lane.b32.xlu1 %v224_v34, %s1329_s17  ;;  %193 = vrot.lane.b32.xlu0 %v180_v35, %s1330_s21 }
  0x40   :  { %195 = vrot.lane.b32.xlu1 %v181_v37, %s1330_s21  ;;  %236 = vrot.lane.b32.xlu0 %v225_v38, %s1329_s17  ;;  %v214_v37 = vmul.f32 %v212_v23, %v1477_v36 }
  0x44   :  { %265 = vrot.lane.b32.xlu1 %v255_v41, %s1330_s21  ;;  %238 = vrot.lane.b32.xlu0 %v226_v42, %s1329_s17 }
  0x48   :  { %240 = vrot.lane.b32.xlu1 %v227_v44, %s1329_s17  ;;  %267 = vrot.lane.b32.xlu0 %v256_v45, %s1330_s21  ;;  %v215_v44 = vmul.f32 %v212_v23, %v1486_v40  ;;  %v1564_v23 = vld [vmem:[%s1835_s7 + $0x18] sm:$0xff] }
  0x4c   :  { %242 = vrot.lane.b32.xlu1 %v228_v47, %s1329_s17  ;;  %269 = vrot.lane.b32.xlu0 %v257_v48, %s1330_s21 }
  0x50   :  { %273 = vrot.lane.b32.xlu1 %v259_v49, %s1330_s21  ;;  %271 = vrot.lane.b32.xlu0 %v258_v50, %s1330_s21 }
  0x8a   :  { %v83_v53 = vpop.permute.xlu1 %82  ;;  %v79_v54 = vpop.permute.xlu0 %78 }
  0x8b   :  { %v93_v56 = vadd.f32 %v79_v54, %v62_v52  ;;  %v95_v7 = vadd.f32 %v83_v53, %v64_v62  ;;  %v286_v62 = vstv %s1135_s28  ;;  %s1145_s28 = sld [smem:[#allocation3 + $0xe]] }
  0x8e   :  { %v110_v59 = vpop.permute.xlu1 %109  ;;  %v81_v60 = vpop.permute.xlu0 %80 }
  0x8f   :  { %v124_v61 = vadd.f32 %v110_v59, %v93_v56  ;;  %v94_v63 = vadd.f32 %v81_v60, %v63_v57 }
  0x91   :  { %v140_v2 = vadd.f32 %v135_v58, %v124_v61 }
  0x92   :  { %v85_v5 = vpop.permute.xlu1 %84  ;;  %v112_v6 = vpop.permute.xlu0 %111 }
  0x93   :  { %v125_v1 = vadd.f32 %v112_v6, %v94_v63  ;;  %v96_v15 = vadd.f32 %v85_v5, %v65_v8  ;;  %v1536_v6 = vld [vmem:[%s1835_s7] sm:$0xff] }
  0x95   :  { %v141_v10 = vadd.f32 %v136_v4, %v125_v1  ;;  %v1541_v1 = vld [vmem:[%s1835_s7 + $0x8] sm:$0xff] }
  0x96   :  { %v87_v11 = vpop.permute.xlu1 %86  ;;  %v114_v13 = vpop.permute.xlu0 %113 }
  0x97   :  { %v126_v14 = vadd.f32 %v114_v13, %v95_v7  ;;  %v97_v21 = vadd.f32 %v87_v11, %v66_v0 }
  0x99   :  { %v142_v16 = vadd.f32 %v137_v3, %v126_v14 }
  0x9a   :  { %v157_v18 = vpop.permute.xlu1 %156  ;;  %v116_v19 = vpop.permute.xlu0 %115 }
  0x9b   :  { %v127_v20 = vadd.f32 %v116_v19, %v96_v15  ;;  %v171_v28 = vadd.f32 %v157_v18, %v140_v2  ;;  %v1552_v15 = vld [vmem:[%s1835_s7 + $0x10] sm:$0xff] }
  0x9d   :  { %v143_v22 = vadd.f32 %v138_v17, %v127_v20 }
  0x9e   :  { %v118_v24 = vpop.permute.xlu1 %117  ;;  %v159_v25 = vpop.permute.xlu0 %158 }
  0x9f   :  { %v128_v27 = vadd.f32 %v118_v24, %v97_v21  ;;  %v172_v35 = vadd.f32 %v159_v25, %v141_v10 }
  0xa1   :  { %v144_v30 = vadd.f32 %v139_v9, %v128_v27  ;;  %v1569_v27 = vld [vmem:[%s1835_s7 + $0x20] sm:$0xf] }
  0xa2   :  { %v188_v33 = vpop.permute.xlu1 %187  ;;  %v161_v12 = vpop.permute.xlu0 %160 }
  0xa3   :  { %v202_v34 = vadd.f32 %v188_v33, %v171_v28  ;;  %v173_v42 = vadd.f32 %v161_v12, %v142_v16 }
  0xa5   :  { %v218_v26 = vadd.f32 %v213_v31, %v202_v34 }
  0xa6   :  { %v163_v38 = vpop.permute.xlu1 %162  ;;  %v190_v39 = vpop.permute.xlu0 %189 }
  0xa7   :  { %v203_v41 = vadd.f32 %v190_v39, %v172_v35  ;;  %v174_v49 = vadd.f32 %v163_v38, %v143_v22 }
  0xa9   :  { %v219_v29 = vadd.f32 %v214_v37, %v203_v41 }
  0xaa   :  { %v165_v45 = vpop.permute.xlu1 %164  ;;  %v192_v47 = vpop.permute.xlu0 %191 }
  0xab   :  { %v204_v48 = vadd.f32 %v192_v47, %v173_v42  ;;  %v175_v54 = vadd.f32 %v165_v45, %v144_v30 }
  0xad   :  { %v220_v50 = vadd.f32 %v215_v44, %v204_v48 }
  0xae   :  { %v235_v51 = vpop.permute.xlu1 %234  ;;  %v194_v52 = vpop.permute.xlu0 %193 }
  0xaf   :  { %v205_v53 = vadd.f32 %v194_v52, %v174_v49  ;;  %v249_v59 = vadd.f32 %v235_v51, %v218_v26 }
  0xb1   :  { %v221_v36 = vadd.f32 %v216_v32, %v205_v53 }
  0xb2   :  { %v196_v56 = vpop.permute.xlu1 %195  ;;  %v237_v57 = vpop.permute.xlu0 %236 }
  0xb3   :  { %v206_v58 = vadd.f32 %v196_v56, %v175_v54  ;;  %v250_v2 = vadd.f32 %v237_v57, %v219_v29 }
  0xb5   :  { %v222_v40 = vadd.f32 %v217_v55, %v206_v58 }
  0xb6   :  { %v266_v60 = vpop.permute.xlu1 %265  ;;  %v239_v61 = vpop.permute.xlu0 %238 }
  0xb7   :  { %v280_v63 = vadd.f32 %v266_v60, %v249_v59  ;;  %v251_v7 = vadd.f32 %v239_v61, %v220_v50 }
  0xb9   :  { %v1531_v4 = vadd.f32 %v286_v62, %v280_v63 }
  0xba   :  { %v241_v43 = vpop.permute.xlu1 %240  ;;  %v268_v5 = vpop.permute.xlu0 %267 }
  0xbb   :  { %v281_v46 = vadd.f32 %v268_v5, %v250_v2  ;;  %v292_v10 = vmul.f32 %v1531_v4, %v1536_v6  ;;  %v252_v0 = vadd.f32 %v241_v43, %v221_v36  ;;  %v1331_v5 = vmov 0.0  }
  0xbc   :  { %411 = vst.msk [vmem:[#allocation2 + $0x8] sm:$0xff] %vm409_vm2, %v1331_v5  ;;  %412 = vst.msk [vmem:[#allocation2 + $0x10] sm:$0xff] %vm409_vm2, %v1331_v5 }
  0xbd   :  { %v1543_v8 = vadd.f32 %v286_v62, %v281_v46  ;;  %v317_v19 = vmul.f32 %v292_v10, %v1531_v4  ;;  %v298_v28 = vsel %vm297_vm0, %v292_v10, 0.0  ;;  %410 = vst.msk [vmem:[#allocation2] sm:$0xff] %vm409_vm2, %v1331_v5  ;;  %413 = vst.msk [vmem:[#allocation2 + $0x18] sm:$0xff] %vm409_vm2, %v1331_v5  ;;  %vm864_vm2 = vcmask 1043456  }
  0xbe   :  { %v243_v3 = vpop.permute.xlu1 %242  ;;  %v270_v11 = vpop.permute.xlu0 %269  ;;  %415 = vst.msk [vmem:[#allocation2 + $0x20] sm:$0x3f] %vm414_vm3, %v1331_v5  ;;  %vm968_vm3 = vcmask 1041408  }
  0xbf   :  { %v293_v13 = vmul.f32 %v1543_v8, %v1541_v1  ;;  %v282_v14 = vadd.f32 %v270_v11, %v251_v7  ;;  %v253_v17 = vadd.f32 %v243_v3, %v222_v40  ;;  %v322_v38 = vsel %vm297_vm0, %v317_v19, 0.0 }
  0xc1   :  { %v318_v16 = vmul.f32 %v293_v13, %v1543_v8  ;;  %v1555_v18 = vadd.f32 %v286_v62, %v282_v14  ;;  %v299_v25 = vsel %vm297_vm0, %v293_v13, 0.0 }
  0xc2   :  { %v274_v20 = vpop.permute.xlu1 %273  ;;  %v272_v21 = vpop.permute.xlu0 %271  ;;  %v300_v35 = vadd.f32 %v299_v25, %v298_v28 }
  0xc3   :  { %v294_v22 = vmul.f32 %v1555_v18, %v1552_v15  ;;  %v284_v9 = vadd.f32 %v274_v20, %v253_v17  ;;  %v283_v24 = vadd.f32 %v272_v21, %v252_v0  ;;  %v323_v30 = vsel %vm297_vm0, %v318_v16, 0.0 }
  0xc4   :  { %v324_v42 = vadd.f32 %v323_v30, %v322_v38  ;;  %v361_v17 = vstv %s1136_s24 }
  0xc5   :  { %v319_v31 = vmul.f32 %v294_v22, %v1555_v18  ;;  %v1574_v33 = vadd.f32 %v286_v62, %v284_v9  ;;  %v1576_v12 = vadd.f32 %v286_v62, %v283_v24  ;;  %v301_v34 = vsel %vm297_vm0, %v294_v22, 0.0 }
  0xc6   :  { %v302_v41 = vadd.f32 %v301_v34, %v300_v35  ;;  %v368_v24 = vstv %s1137_s25 }
  0xc7   :  { %v295_v26 = vmul.f32 %v1576_v12, %v1564_v23  ;;  %v296_v37 = vmul.f32 %v1574_v33, %v1569_v27  ;;  %v325_v39 = vsel %vm297_vm0, %v319_v31, 0.0 }
  0xc8   :  { %v326_v48 = vadd.f32 %v325_v39, %v324_v42 }
  0xc9   :  { %v303_v29 = vsel %vm297_vm0, %v295_v26, 0.0  ;;  %v320_v44 = vmul.f32 %v295_v26, %v1576_v12  ;;  %v321_v45 = vmul.f32 %v296_v37, %v1574_v33  ;;  %v306_v49 = vsel %vm305_vm1, %v296_v37, 0.0 }
  0xca   :  { %v304_v47 = vadd.f32 %v303_v29, %v302_v41 }
  0xcb   :  { %v327_v50 = vsel %vm297_vm0, %v320_v44, 0.0  ;;  %v329_v52 = vsel %vm305_vm1, %v321_v45, 0.0 }
  0xcc   :  { %v307_v32 = vadd.f32 %v306_v49, %v304_v47  ;;  %v328_v51 = vadd.f32 %v327_v50, %v326_v48 }
  0xce   :  { %308 = vadd.xlane.f32.xlu0 %v307_v32  ;;  %v330_v53 = vadd.f32 %v329_v52, %v328_v51 }
  0xd0   :  { %331 = vadd.xlane.f32.xlu1 %v330_v53 }
 0x15b   :  { %v309_v54 = vpop.xlane.xlu0 %308 }
 0x15c   :  { %v310_v36 = vrot.slane %v309_v54, 4 }
 0x15d   :  { %v332_v55 = vpop.xlane.xlu1 %331 }
 0x15e   :  { %v311_v56 = vadd.f32 %v310_v36, %v309_v54  ;;  %v333_v57 = vrot.slane %v332_v55, 4 }
 0x160   :  { %v312_v58 = vrot.slane %v311_v56, 2  ;;  %v334_v59 = vadd.f32 %v333_v57, %v332_v55 }
 0x162   :  { %v335_v40 = vrot.slane %v334_v59, 2  ;;  %v313_v60 = vadd.f32 %v312_v58, %v311_v56 }
 0x164   :  { %v314_v61 = vrot.slane %v313_v60, 1  ;;  %v336_v62 = vadd.f32 %v335_v40, %v334_v59 }
 0x166   :  { %v315_v63 = vadd.f32 %v314_v61, %v313_v60  ;;  %v337_v2 = vrot.slane %v336_v62, 1 }
 0x168   :  { %1237 = vpush %v315_v63  ;;  %v338_v43 = vadd.f32 %v337_v2, %v336_v62 }
 0x16a   :  { %1239 = vpush %v338_v43 }
 0x199   :  { %s1238_s7 = spop %1237 }
 0x19a   :  { %s340_s16 = smul.f32 0.001953125, %s1238_s7 }
 0x19b   :  { %s1240_s18 = spop %1239 }
 0x19c   :  { %s342_s19 = smul.f32 %s340_s16, %s340_s16  ;;  %v344_v10 = vstv %s340_s16 }
 0x19d   :  { %s341_s20 = smul.f32 0.001953125, %s1240_s18  ;;  %v345_v3 = vsub.f32 %v1531_v4, %v344_v10  ;;  %v346_v11 = vsub.f32 %v1543_v8, %v344_v10  ;;  %v347_v13 = vsub.f32 %v1555_v18, %v344_v10  ;;  %v348_v14 = vsub.f32 %v1576_v12, %v344_v10 }
 0x19e   :  { %v349_v0 = vsub.f32 %v1574_v33, %v344_v10 }
 0x19f   :  { %s343_s22 = ssub.f32 %s341_s20, %s342_s19 }
 0x1a1   :  { %s350_s23 = sadd.f32 1e-05, %s343_s22 }
 0x1a3   :  { %v351_v46 = vstv %s350_s23 }
 0x1a4   :  { %1254 = vrsqrt.f32 %v351_v46 }
 0x1ae   :  { %v1255_v7 = vpop.eup %1254 }
 0x1af   :  { %1241 = vpush %v1255_v7  ;;  %v463_v7 = vstv %s1144_s27 }
 0x1e0   :  { %s1242_s1 = spop %1241 }
 0x1e1   :  { %v354_v16 = vstv %s1242_s1  ;;  %s1153_s1 = sld [smem:[#allocation3 + $0x16]] }
 0x1e2   :  { %v355_v19 = vmul.f32 %v354_v16, %v345_v3  ;;  %v356_v20 = vmul.f32 %v354_v16, %v346_v11  ;;  %v357_v21 = vmul.f32 %v354_v16, %v347_v13  ;;  %v358_v22 = vmul.f32 %v354_v16, %v348_v14 }
 0x1e3   :  { %v359_v9 = vmul.f32 %v354_v16, %v349_v0  ;;  %v494_v0 = vstv %s1145_s28  ;;  %s1160_s28 = sld [smem:[#allocation3 + $0x18]] }
 0x1e4   :  { %v362_v25 = vmul.f32 %v361_v17, %v355_v19  ;;  %v363_v28 = vmul.f32 %v361_v17, %v356_v20  ;;  %v364_v4 = vmul.f32 %v361_v17, %v357_v21  ;;  %v365_v30 = vmul.f32 %v361_v17, %v358_v22 }
 0x1e5   :  { %v366_v8 = vmul.f32 %v361_v17, %v359_v9 }
 0x1e6   :  { %v370_v31 = vadd.f32 %v368_v24, %v363_v28  ;;  %v369_v18 = vadd.f32 %v368_v24, %v362_v25  ;;  %v372_v34 = vadd.f32 %v368_v24, %v365_v30  ;;  %v371_v12 = vadd.f32 %v368_v24, %v364_v4 }
 0x1e7   :  { %v373_v35 = vadd.f32 %v368_v24, %v366_v8  ;;  %v541_v4 = vstv %s1147_s29  ;;  %s1161_s29 = sld [smem:[#allocation3 + $0x19]] }
 0x1e8   :  { %v380_v26 = vmin.f32 %v370_v31, 0.0  ;;  %v379_v33 = vmin.f32 %v369_v18, 0.0  ;;  %v382_v37 = vmin.f32 %v372_v34, 0.0  ;;  %v381_v38 = vmin.f32 %v371_v12, 0.0 }
 0x1e9   :  { %v383_v42 = vmin.f32 %v373_v35, 0.0  ;;  %vm375_vm4 = vcmp.gt.f32.partialorder %v370_v31, 0.0  ;;  %vm374_vm5 = vcmp.gt.f32.partialorder %v369_v18, 0.0  ;;  %vm377_vm6 = vcmp.gt.f32.partialorder %v372_v34, 0.0 }
 0x1ea   :  { %v386_v39 = vmul.f32 1.442695, %v380_v26  ;;  %v384_v41 = vmul.f32 1.442695, %v379_v33  ;;  %v390_v29 = vmul.f32 1.442695, %v382_v37 }
 0x1eb   :  { %v388_v44 = vmul.f32 1.442695, %v381_v38  ;;  %v392_v45 = vmul.f32 1.442695, %v383_v42  ;;  %vm376_vm7 = vcmp.gt.f32.partialorder %v371_v12, 0.0  ;;  %vm378_vm8 = vcmp.gt.f32.partialorder %v373_v35, 0.0 }
 0x1ec   :  { %1256 = vpow2.f32 %v386_v39 }
 0x1ed   :  { %1258 = vpow2.f32 %v384_v41 }
 0x1ee   :  { %1260 = vpow2.f32 %v390_v29 }
 0x1ef   :  { %1262 = vpow2.f32 %v388_v44 }
 0x1f0   :  { %1264 = vpow2.f32 %v392_v45  ;;  %v619_v45 = vstv %s1150_s9 }
 0x1f6   :  { %v1257_v47 = vpop.eup %1256 }
 0x1f7   :  { %v1259_v48 = vpop.eup %1258  ;;  %v1139_v49 = vadd.f32 -1.0, %v1257_v47 }
 0x1f8   :  { %v1261_v50 = vpop.eup %1260  ;;  %v1138_v32 = vadd.f32 -1.0, %v1259_v48 }
 0x1f9   :  { %v1263_v51 = vpop.eup %1262  ;;  %v400_v52 = vsel %vm375_vm4, %v370_v31, %v1139_v49  ;;  %v1141_v53 = vadd.f32 -1.0, %v1261_v50 }
 0x1fa   :  { %v1265_v54 = vpop.eup %1264  ;;  %v405_v36 = vmul.f32 %v400_v52, %v1541_v1  ;;  %v399_v55 = vsel %vm374_vm5, %v369_v18, %v1138_v32  ;;  %v1140_v56 = vadd.f32 -1.0, %v1263_v51  ;;  %v650_v52 = vstv %s1151_s10 }
 0x1fb   :  { %v404_v57 = vmul.f32 %v399_v55, %v1536_v6  ;;  %v402_v58 = vsel %vm377_vm6, %v372_v34, %v1141_v53  ;;  %v1142_v40 = vadd.f32 -1.0, %v1265_v54 }
 0x1fc   :  { %423 = vrot.lane.b32.xlu1 %v405_v36, %s1332_s26  ;;  %v401_v59 = vsel %vm376_vm7, %v371_v12, %v1140_v56  ;;  %v407_v60 = vmul.f32 %v402_v58, %v1564_v23 }
 0x1fd   :  { %421 = vrot.lane.b32.xlu0 %v404_v57, %s1332_s26  ;;  %v406_v61 = vmul.f32 %v401_v59, %v1552_v15  ;;  %v403_v62 = vsel %vm378_vm8, %v373_v35, %v1142_v40  ;;  %v572_v35 = vstv %s1148_s30 }
 0x1fe   :  { %v408_v63 = vmul.f32 %v403_v62, %v1569_v27 }
 0x200   :  { %427 = vrot.lane.b32.xlu1 %v407_v60, %s1332_s26 }
 0x201   :  { %425 = vrot.lane.b32.xlu0 %v406_v61, %s1332_s26  ;;  %v457_v61 = vstv %s1143_s11 }
 0x205   :  { %429 = vrot.lane.b32.xlu0 %v408_v63, %s1332_s26  ;;  %s1154_s26 = sld [smem:[#allocation3 + $0x17]] }
 0x26e   :  { %v424_v2 = vpop.permute.xlu1 %423 }
 0x26f   :  { %438 = vst.msk [vmem:[#allocation2 + $0x9] sm:$0xff] %vm436_vm9, %v424_v2  ;;  %v422_v43 = vpop.permute.xlu0 %421 }
 0x270   :  { %437 = vst.msk [vmem:[#allocation2 + $0x1] sm:$0xff] %vm436_vm9, %v422_v43  ;;  %v530_v43 = vstv %s1146_s12 }
 0x272   :  { %v428_v5 = vpop.permute.xlu1 %427 }
 0x273   :  { %440 = vst.msk [vmem:[#allocation2 + $0x19] sm:$0xff] %vm436_vm9, %v428_v5  ;;  %v426_v46 = vpop.permute.xlu0 %425 }
 0x274   :  { %439 = vst.msk [vmem:[#allocation2 + $0x11] sm:$0xff] %vm436_vm9, %v426_v46 }
 0x276   :  { %v1631_v31 = vld [vmem:[#allocation2 + $0x9] sm:$0xff] }
 0x277   :  { %v430_v10 = vpop.permute.xlu0 %429  ;;  %v1601_v3 = vld [vmem:[#allocation2 + $0x8] sm:$0xff]  ;;  %v1603_v11 = vld [vmem:[#allocation2] sm:$0xff]  ;;  %v543_v18 = vmul.f32 %v541_v4, %v1631_v31  ;;  %v574_v38 = vmul.f32 %v572_v35, %v1631_v31 }
 0x278   :  { %442 = vst.msk [vmem:[#allocation2 + $0x21] sm:$0xf] %vm441_vm10, %v430_v10  ;;  %v465_v13 = vmul.f32 %v463_v7, %v1601_v3  ;;  %v464_v14 = vmul.f32 %v463_v7, %v1603_v11  ;;  %v495_v17 = vmul.f32 %v494_v0, %v1603_v11  ;;  %v496_v22 = vmul.f32 %v494_v0, %v1601_v3  ;;  %v1625_v28 = vld [vmem:[#allocation2 + $0x1] sm:$0xff] }
 0x279   :  { %v542_v8 = vmul.f32 %v541_v4, %v1625_v28  ;;  %v573_v33 = vmul.f32 %v572_v35, %v1625_v28  ;;  %v1655_v44 = vld [vmem:[#allocation2 + $0x2] sm:$0xff]  ;;  %v458_v2 = vmul.f32 %v457_v61, %v1603_v11  ;;  %v459_v10 = vmul.f32 %v457_v61, %v1601_v3 }
 0x27a   :  { %476 = vrot.lane.b32.xlu0 %v465_v13, %s1329_s17  ;;  %474 = vrot.lane.b32.xlu1 %v464_v14, %s1329_s17  ;;  %v1643_v37 = vld [vmem:[#allocation2 + $0x19] sm:$0xff]  ;;  %v620_v48 = vmul.f32 %v619_v45, %v1655_v44  ;;  %v651_v54 = vmul.f32 %v650_v52, %v1655_v44  ;;  %v531_v14 = vmul.f32 %v530_v43, %v1625_v28 }
 0x27b   :  { %v1609_v16 = vld [vmem:[#allocation2 + $0x10] sm:$0xff]  ;;  %v1613_v20 = vld [vmem:[#allocation2 + $0x18] sm:$0xff]  ;;  %v545_v39 = vmul.f32 %v541_v4, %v1643_v37  ;;  %v576_v47 = vmul.f32 %v572_v35, %v1643_v37 }
 0x27c   :  { %v466_v19 = vmul.f32 %v463_v7, %v1609_v16  ;;  %v467_v21 = vmul.f32 %v463_v7, %v1613_v20  ;;  %v497_v24 = vmul.f32 %v494_v0, %v1609_v16  ;;  %v498_v30 = vmul.f32 %v494_v0, %v1613_v20  ;;  %v1637_v12 = vld [vmem:[#allocation2 + $0x11] sm:$0xff] }
 0x27d   :  { %v544_v26 = vmul.f32 %v541_v4, %v1637_v12  ;;  %v575_v42 = vmul.f32 %v572_v35, %v1637_v12  ;;  %v1661_v49 = vld [vmem:[#allocation2 + $0xa] sm:$0xff]  ;;  %v1667_v51 = vld [vmem:[#allocation2 + $0x12] sm:$0xff]  ;;  %v533_v3 = vmul.f32 %v530_v43, %v1637_v12 }
 0x27e   :  { %505 = vrot.lane.b32.xlu0 %v495_v17, %s1330_s21  ;;  %478 = vrot.lane.b32.xlu1 %v466_v19, %s1329_s17  ;;  %v621_v50 = vmul.f32 %v619_v45, %v1661_v49  ;;  %v622_v53 = vmul.f32 %v619_v45, %v1667_v51  ;;  %v652_v55 = vmul.f32 %v650_v52, %v1661_v49 }
 0x27f   :  { %v1619_v9 = vld [vmem:[#allocation2 + $0x20] sm:$0xf]  ;;  %v653_v58 = vmul.f32 %v650_v52, %v1667_v51 }
 0x280   :  { %v468_v25 = vmul.f32 %v463_v7, %v1619_v9  ;;  %v499_v34 = vmul.f32 %v494_v0, %v1619_v9  ;;  %v1649_v41 = vld [vmem:[#allocation2 + $0x21] sm:$0xf] }
 0x281   :  { %v546_v29 = vmul.f32 %v541_v4, %v1649_v41  ;;  %v577_v32 = vmul.f32 %v572_v35, %v1649_v41  ;;  %v1673_v36 = vld [vmem:[#allocation2 + $0x1a] sm:$0xff]  ;;  %v1679_v57 = vld [vmem:[#allocation2 + $0x22] sm:$0xf] }
 0x282   :  { %480 = vrot.lane.b32.xlu0 %v467_v21, %s1329_s17  ;;  %507 = vrot.lane.b32.xlu1 %v496_v22, %s1330_s21  ;;  %v623_v56 = vmul.f32 %v619_v45, %v1673_v36  ;;  %v624_v59 = vmul.f32 %v619_v45, %v1679_v57  ;;  %v654_v40 = vmul.f32 %v650_v52, %v1673_v36 }
 0x283   :  { %v655_v60 = vmul.f32 %v650_v52, %v1679_v57  ;;  %v460_v22 = vmul.f32 %v457_v61, %v1609_v16 }
 0x286   :  { %509 = vrot.lane.b32.xlu1 %v497_v24, %s1330_s21  ;;  %482 = vrot.lane.b32.xlu0 %v468_v25, %s1329_s17  ;;  %v532_v25 = vmul.f32 %v530_v43, %v1631_v31 }
 0x28a   :  { %511 = vrot.lane.b32.xlu1 %v498_v30, %s1330_s21  ;;  %552 = vrot.lane.b32.xlu0 %v542_v8, %s1329_s17 }
 0x28e   :  { %554 = vrot.lane.b32.xlu1 %v543_v18, %s1329_s17  ;;  %513 = vrot.lane.b32.xlu0 %v499_v34, %s1330_s21  ;;  %v461_v18 = vmul.f32 %v457_v61, %v1613_v20  ;;  %v535_v20 = vmul.f32 %v530_v43, %v1649_v41 }
 0x292   :  { %556 = vrot.lane.b32.xlu1 %v544_v26, %s1329_s17  ;;  %583 = vrot.lane.b32.xlu0 %v573_v33, %s1330_s21 }
 0x296   :  { %585 = vrot.lane.b32.xlu1 %v574_v38, %s1330_s21  ;;  %558 = vrot.lane.b32.xlu0 %v545_v39, %s1329_s17  ;;  %v462_v38 = vmul.f32 %v457_v61, %v1619_v9  ;;  %v534_v39 = vmul.f32 %v530_v43, %v1643_v37 }
 0x29a   :  { %587 = vrot.lane.b32.xlu1 %v575_v42, %s1330_s21  ;;  %560 = vrot.lane.b32.xlu0 %v546_v29, %s1329_s17 }
 0x29e   :  { %589 = vrot.lane.b32.xlu1 %v576_v47, %s1330_s21  ;;  %630 = vrot.lane.b32.xlu0 %v620_v48, %s1329_s17 }
 0x2a2   :  { %632 = vrot.lane.b32.xlu1 %v621_v50, %s1329_s17  ;;  %591 = vrot.lane.b32.xlu0 %v577_v32, %s1330_s21 }
 0x2a6   :  { %634 = vrot.lane.b32.xlu1 %v622_v53, %s1329_s17  ;;  %661 = vrot.lane.b32.xlu0 %v651_v54, %s1330_s21 }
 0x2aa   :  { %663 = vrot.lane.b32.xlu1 %v652_v55, %s1330_s21  ;;  %636 = vrot.lane.b32.xlu0 %v623_v56, %s1329_s17 }
 0x2ae   :  { %665 = vrot.lane.b32.xlu1 %v653_v58, %s1330_s21  ;;  %638 = vrot.lane.b32.xlu0 %v624_v59, %s1329_s17  ;;  %s1149_s17 = sld [smem:[#allocation3 + $0x12]] }
 0x2b2   :  { %667 = vrot.lane.b32.xlu1 %v654_v40, %s1330_s21  ;;  %669 = vrot.lane.b32.xlu0 %v655_v60, %s1330_s21  ;;  %s1152_s21 = sld [smem:[#allocation3 + $0x15]] }
 0x2b4   :  { %v608_v48 = vstv %s1149_s17 }
 0x2b5   :  { %v609_v54 = vmul.f32 %v608_v48, %v1655_v44  ;;  %v610_v59 = vmul.f32 %v608_v48, %v1661_v49  ;;  %v612_v44 = vmul.f32 %v608_v48, %v1673_v36 }
 0x2ec   :  { %v475_v62 = vpop.permute.xlu1 %474  ;;  %v477_v63 = vpop.permute.xlu0 %476 }
 0x2ed   :  { %v489_v5 = vadd.f32 %v475_v62, %v458_v2  ;;  %v490_v0 = vadd.f32 %v477_v63, %v459_v10  ;;  %v611_v63 = vmul.f32 %v608_v48, %v1667_v51  ;;  %v682_v51 = vstv %s1152_s21 }
 0x2f0   :  { %v479_v46 = vpop.permute.xlu1 %478  ;;  %v506_v7 = vpop.permute.xlu0 %505 }
 0x2f1   :  { %v520_v13 = vadd.f32 %v506_v7, %v489_v5  ;;  %v491_v4 = vadd.f32 %v479_v46, %v460_v22 }
 0x2f3   :  { %v536_v17 = vadd.f32 %v531_v14, %v520_v13 }
 0x2f4   :  { %v508_v19 = vpop.permute.xlu1 %507  ;;  %v481_v21 = vpop.permute.xlu0 %480 }
 0x2f5   :  { %v521_v24 = vadd.f32 %v508_v19, %v490_v0  ;;  %v492_v28 = vadd.f32 %v481_v21, %v461_v18 }
 0x2f7   :  { %v537_v11 = vadd.f32 %v532_v25, %v521_v24 }
 0x2f8   :  { %v510_v30 = vpop.permute.xlu1 %509  ;;  %v483_v8 = vpop.permute.xlu0 %482 }
 0x2f9   :  { %v522_v34 = vadd.f32 %v510_v30, %v491_v4  ;;  %v493_v31 = vadd.f32 %v483_v8, %v462_v38 }
 0x2fb   :  { %v538_v35 = vadd.f32 %v533_v3, %v522_v34 }
 0x2fc   :  { %v512_v26 = vpop.permute.xlu1 %511  ;;  %v553_v33 = vpop.permute.xlu0 %552 }
 0x2fd   :  { %v523_v16 = vadd.f32 %v512_v26, %v492_v28  ;;  %v567_v50 = vadd.f32 %v553_v33, %v536_v17  ;;  %v613_v17 = vmul.f32 %v608_v48, %v1679_v57 }
 0x2ff   :  { %v539_v42 = vadd.f32 %v534_v39, %v523_v16 }
 0x300   :  { %v555_v29 = vpop.permute.xlu1 %554  ;;  %v514_v45 = vpop.permute.xlu0 %513 }
 0x301   :  { %v524_v47 = vadd.f32 %v514_v45, %v493_v31  ;;  %v568_v55 = vadd.f32 %v555_v29, %v537_v11 }
 0x303   :  { %v540_v12 = vadd.f32 %v535_v20, %v524_v47 }
 0x304   :  { %v557_v32 = vpop.permute.xlu1 %556  ;;  %v584_v52 = vpop.permute.xlu0 %583 }
 0x305   :  { %v598_v53 = vadd.f32 %v584_v52, %v567_v50  ;;  %v569_v40 = vadd.f32 %v557_v32, %v538_v35 }
 0x307   :  { %v614_v9 = vadd.f32 %v609_v54, %v598_v53 }
 0x308   :  { %v586_v56 = vpop.permute.xlu1 %585  ;;  %v559_v58 = vpop.permute.xlu0 %558 }
 0x309   :  { %v599_v37 = vadd.f32 %v586_v56, %v568_v55  ;;  %v570_v2 = vadd.f32 %v559_v58, %v539_v42 }
 0x30b   :  { %v615_v60 = vadd.f32 %v610_v59, %v599_v37 }
 0x30c   :  { %v588_v61 = vpop.permute.xlu1 %587  ;;  %v561_v62 = vpop.permute.xlu0 %560 }
 0x30d   :  { %v600_v41 = vadd.f32 %v588_v61, %v569_v40  ;;  %v571_v10 = vadd.f32 %v561_v62, %v540_v12 }
 0x30f   :  { %v616_v43 = vadd.f32 %v611_v63, %v600_v41 }
 0x310   :  { %v590_v5 = vpop.permute.xlu1 %589  ;;  %v631_v46 = vpop.permute.xlu0 %630 }
 0x311   :  { %v601_v7 = vadd.f32 %v590_v5, %v570_v2  ;;  %v645_v19 = vadd.f32 %v631_v46, %v614_v9 }
 0x313   :  { %v617_v13 = vadd.f32 %v612_v44, %v601_v7 }
 0x314   :  { %v633_v14 = vpop.permute.xlu1 %632  ;;  %v592_v0 = vpop.permute.xlu0 %591 }
 0x315   :  { %v602_v49 = vadd.f32 %v592_v0, %v571_v10  ;;  %v646_v4 = vadd.f32 %v633_v14, %v615_v60 }
 0x317   :  { %v618_v21 = vadd.f32 %v613_v17, %v602_v49 }
 0x318   :  { %v635_v22 = vpop.permute.xlu1 %634  ;;  %v662_v24 = vpop.permute.xlu0 %661 }
 0x319   :  { %v676_v25 = vadd.f32 %v662_v24, %v645_v19  ;;  %v647_v36 = vadd.f32 %v635_v22, %v616_v43 }
 0x31b   :  { %v1706_v11 = vadd.f32 %v682_v51, %v676_v25 }
 0x31c   :  { %v664_v30 = vpop.permute.xlu1 %663  ;;  %v637_v8 = vpop.permute.xlu0 %636 }
 0x31d   :  { %v677_v18 = vadd.f32 %v664_v30, %v646_v4  ;;  %v688_v3 = vmul.f32 %v1706_v11, %v1536_v6  ;;  %v648_v38 = vadd.f32 %v637_v8, %v617_v13 }
 0x31f   :  { %v1708_v34 = vadd.f32 %v682_v51, %v677_v18  ;;  %v711_v31 = vmul.f32 %v688_v3, %v1706_v11  ;;  %v693_v50 = vsel %vm297_vm0, %v688_v3, 0.0  ;;  %v847_v18 = vld [vmem:[%s1833_s5] sm:$0xff]  ;;  %v954_v3 = vld [vmem:[%s1834_s6 + $0x8] sm:$0xff] }
 0x320   :  { %v666_v28 = vpop.permute.xlu1 %665  ;;  %v639_v57 = vpop.permute.xlu0 %638  ;;  %1207 = vmatprep.mubr.msk.f32.mxu0 %vm851_vm11, %v847_v18 }
 0x321   :  { %v689_v35 = vmul.f32 %v1708_v34, %v1541_v1  ;;  %v678_v26 = vadd.f32 %v666_v28, %v647_v36  ;;  %v649_v39 = vadd.f32 %v639_v57, %v618_v21  ;;  %v716_v58 = vsel %vm297_vm0, %v711_v31, 0.0  ;;  %v953_v36 = vld [vmem:[%s1834_s6] sm:$0xff] }
 0x322   :  { %v1233_v28 = vpack.c.bf16 %v954_v3, %v953_v36 }
 0x323   :  { %v712_v33 = vmul.f32 %v689_v35, %v1708_v34  ;;  %v1715_v16 = vadd.f32 %v682_v51, %v678_v26  ;;  %v694_v48 = vsel %vm297_vm0, %v689_v35, 0.0 }
 0x324   :  { %v668_v42 = vpop.permute.xlu1 %667  ;;  %v670_v29 = vpop.permute.xlu0 %669  ;;  %v695_v55 = vadd.f32 %v694_v48, %v693_v50  ;;  %1234 = vmatprep.subr.bf16.mxu1 %v1233_v28 }
 0x325   :  { %v690_v45 = vmul.f32 %v1715_v16, %v1552_v15  ;;  %v679_v47 = vadd.f32 %v668_v42, %v648_v38  ;;  %v680_v20 = vadd.f32 %v670_v29, %v649_v39  ;;  %v717_v12 = vsel %vm297_vm0, %v712_v33, 0.0  ;;  %1236 = vmatpush3.bf16.msra.mxu1 %v1233_v28 }
 0x326   :  { %v718_v40 = vadd.f32 %v717_v12, %v716_v58  ;;  %v755_v29 = vstv %s1153_s1  ;;  %v762_v12 = vstv %s1154_s26 }
 0x327   :  { %v713_v32 = vmul.f32 %v690_v45, %v1715_v16  ;;  %v1724_v52 = vadd.f32 %v682_v51, %v679_v47  ;;  %v1726_v53 = vadd.f32 %v682_v51, %v680_v20  ;;  %v696_v54 = vsel %vm297_vm0, %v690_v45, 0.0 }
 0x328   :  { %v697_v59 = vadd.f32 %v696_v54, %v695_v55 }
 0x329   :  { %v691_v9 = vmul.f32 %v1724_v52, %v1564_v23  ;;  %v692_v56 = vmul.f32 %v1726_v53, %v1569_v27  ;;  %v719_v37 = vsel %vm297_vm0, %v713_v32, 0.0 }
 0x32a   :  { %v720_v63 = vadd.f32 %v719_v37, %v718_v40 }
 0x32b   :  { %v698_v60 = vsel %vm297_vm0, %v691_v9, 0.0  ;;  %v714_v61 = vmul.f32 %v691_v9, %v1724_v52  ;;  %v715_v62 = vmul.f32 %v692_v56, %v1726_v53  ;;  %v700_v2 = vsel %vm305_vm1, %v692_v56, 0.0 }
 0x32c   :  { %v699_v41 = vadd.f32 %v698_v60, %v697_v59 }
 0x32d   :  { %v721_v43 = vsel %vm297_vm0, %v714_v61, 0.0  ;;  %v723_v7 = vsel %vm305_vm1, %v715_v62, 0.0 }
 0x32e   :  { %v701_v5 = vadd.f32 %v700_v2, %v699_v41  ;;  %v722_v46 = vadd.f32 %v721_v43, %v720_v63 }
 0x330   :  { %702 = vadd.xlane.f32.xlu1 %v701_v5  ;;  %v724_v44 = vadd.f32 %v723_v7, %v722_v46 }
 0x332   :  { %725 = vadd.xlane.f32.xlu0 %v724_v44 }
 0x3bd   :  { %v703_v10 = vpop.xlane.xlu1 %702 }
 0x3be   :  { %v704_v13 = vrot.slane %v703_v10, 4 }
 0x3bf   :  { %v726_v14 = vpop.xlane.xlu0 %725 }
 0x3c0   :  { %v705_v0 = vadd.f32 %v704_v13, %v703_v10  ;;  %v727_v49 = vrot.slane %v726_v14, 4  ;;  %v804_v10 = vstv %s1160_s28 }
 0x3c2   :  { %v706_v17 = vrot.slane %v705_v0, 2  ;;  %v728_v19 = vadd.f32 %v727_v49, %v726_v14  ;;  %v811_v49 = vstv %s1161_s29 }
 0x3c4   :  { %v707_v21 = vadd.f32 %v706_v17, %v705_v0  ;;  %v729_v22 = vrot.slane %v728_v19, 2 }
 0x3c6   :  { %v730_v24 = vadd.f32 %v729_v22, %v728_v19  ;;  %v708_v51 = vrot.slane %v707_v21, 1 }
 0x3c8   :  { %v709_v25 = vadd.f32 %v708_v51, %v707_v21  ;;  %v731_v4 = vrot.slane %v730_v24, 1 }
 0x3ca   :  { %1243 = vpush %v709_v25  ;;  %v732_v30 = vadd.f32 %v731_v4, %v730_v24 }
 0x3cc   :  { %1245 = vpush %v732_v30 }
 0x3fb   :  { %s1244_s13 = spop %1243 }
 0x3fc   :  { %s734_s0 = smul.f32 0.001953125, %s1244_s13 }
 0x3fd   :  { %s1246_s14 = spop %1245 }
 0x3fe   :  { %s736_s15 = smul.f32 %s734_s0, %s734_s0  ;;  %v738_v35 = vstv %s734_s0 }
 0x3ff   :  { %s735_s7 = smul.f32 0.001953125, %s1246_s14  ;;  %v739_v26 = vsub.f32 %v1706_v11, %v738_v35  ;;  %v740_v33 = vsub.f32 %v1708_v34, %v738_v35  ;;  %v741_v38 = vsub.f32 %v1715_v16, %v738_v35  ;;  %v742_v39 = vsub.f32 %v1724_v52, %v738_v35 }
 0x400   :  { %v743_v31 = vsub.f32 %v1726_v53, %v738_v35 }
 0x401   :  { %s737_s16 = ssub.f32 %s735_s7, %s736_s15 }
 0x403   :  { %s744_s18 = sadd.f32 1e-05, %s737_s16 }
 0x405   :  { %v745_v8 = vstv %s744_s18 }
 0x406   :  { %1266 = vrsqrt.f32 %v745_v8 }
 0x410   :  { %v1267_v57 = vpop.eup %1266 }
 0x411   :  { %1247 = vpush %v1267_v57 }
 0x442   :  { %s1248_s27 = spop %1247 }
 0x443   :  { %v748_v42 = vstv %s1248_s27 }
 0x444   :  { %v749_v45 = vmul.f32 %v748_v42, %v739_v26  ;;  %v750_v47 = vmul.f32 %v748_v42, %v740_v33  ;;  %v751_v20 = vmul.f32 %v748_v42, %v741_v38  ;;  %v752_v48 = vmul.f32 %v748_v42, %v742_v39 }
 0x445   :  { %v753_v50 = vmul.f32 %v748_v42, %v743_v31 }
 0x446   :  { %v756_v32 = vmul.f32 %v755_v29, %v749_v45  ;;  %v757_v54 = vmul.f32 %v755_v29, %v750_v47  ;;  %v758_v11 = vmul.f32 %v755_v29, %v751_v20  ;;  %v759_v55 = vmul.f32 %v755_v29, %v752_v48 }
 0x447   :  { %v760_v34 = vmul.f32 %v755_v29, %v753_v50 }
 0x448   :  { %v763_v9 = vadd.f32 %v762_v12, %v756_v32  ;;  %v764_v16 = vadd.f32 %v762_v12, %v757_v54  ;;  %v765_v56 = vadd.f32 %v762_v12, %v758_v11  ;;  %v766_v52 = vadd.f32 %v762_v12, %v759_v55 }
 0x449   :  { %v767_v58 = vadd.f32 %v762_v12, %v760_v34 }
 0x44a   :  { %v773_v37 = vmin.f32 %v763_v9, 0.0  ;;  %v774_v53 = vmin.f32 %v764_v16, 0.0  ;;  %v775_v59 = vmin.f32 %v765_v56, 0.0  ;;  %v776_v40 = vmin.f32 %v766_v52, 0.0 }
 0x44b   :  { %v777_v60 = vmin.f32 %v767_v58, 0.0  ;;  %vm768_vm12 = vcmp.gt.f32.partialorder %v763_v9, 0.0  ;;  %vm769_vm13 = vcmp.gt.f32.partialorder %v764_v16, 0.0  ;;  %vm770_vm14 = vcmp.gt.f32.partialorder %v765_v56, 0.0 }
 0x44c   :  { %v778_v61 = vmul.f32 1.442695, %v773_v37  ;;  %v780_v62 = vmul.f32 1.442695, %v774_v53  ;;  %v782_v41 = vmul.f32 1.442695, %v775_v59 }
 0x44d   :  { %v784_v63 = vmul.f32 1.442695, %v776_v40  ;;  %v786_v2 = vmul.f32 1.442695, %v777_v60  ;;  %vm771_vm15 = vcmp.gt.f32.partialorder %v766_v52, 0.0  ;;  %vm772_vm1 = vcmp.gt.f32.partialorder %v767_v58, 0.0 }
 0x44e   :  { %1268 = vpow2.f32 %v778_v61  ;;  %v848_v37 = vld [vmem:[%s1833_s5 + $0x8] sm:$0xff]  ;;  %v849_v53 = vld [vmem:[%s1833_s5 + $0x10] sm:$0xff]  ;;  %v850_v59 = vld [vmem:[%s1833_s5 + $0x18] sm:$0xff] }
 0x44f   :  { %1270 = vpow2.f32 %v780_v62  ;;  %v955_v40 = vld [vmem:[%s1834_s6 + $0x10] sm:$0x3] }
 0x450   :  { %1272 = vpow2.f32 %v782_v41  ;;  %1217 = vmatprep.subr.msk.mxu1 %vm968_vm3, %v955_v40 }
 0x451   :  { %1274 = vpow2.f32 %v784_v63  ;;  %1218 = vmatpush3.msk.msra.mxu1 %vm968_vm3, %v955_v40  ;;  %v1058_v63 = vld [vmem:[%s1831_s3 + $0x8] sm:$0xff] }
 0x452   :  { %1276 = vpow2.f32 %v786_v2  ;;  %v1062_v2 = vld [vmem:[%s1832_s4 + $0x8] sm:$0xff] }
 0x458   :  { %v1269_v43 = vpop.eup %1268 }
 0x459   :  { %v1271_v5 = vpop.eup %1270  ;;  %v1155_v46 = vadd.f32 -1.0, %v1269_v43  ;;  %v1066_v43 = vld [vmem:[%s1830_s2 + $0x8] sm:$0xff] }
 0x45a   :  { %v1273_v7 = vpop.eup %1272  ;;  %v1156_v44 = vadd.f32 -1.0, %v1271_v5  ;;  %v1057_v5 = vld [vmem:[%s1831_s3] sm:$0xff] }
 0x45b   :  { %v1275_v13 = vpop.eup %1274  ;;  %v1157_v14 = vadd.f32 -1.0, %v1273_v7  ;;  %v793_v0 = vsel %vm768_vm12, %v763_v9, %v1155_v46  ;;  %v1061_v46 = vld [vmem:[%s1832_s4] sm:$0xff] }
 0x45c   :  { %v1277_v17 = vpop.eup %1276  ;;  %v1158_v19 = vadd.f32 -1.0, %v1275_v13  ;;  %v794_v21 = vsel %vm769_vm13, %v764_v16, %v1156_v44  ;;  %v798_v22 = vmul.f32 %v793_v0, %v1536_v6  ;;  %v1065_v7 = vld [vmem:[%s1830_s2] sm:$0xff]  ;;  %v1070_v44 = vadd.f32 %v1062_v2, %v1058_v63 }
 0x45d   :  { %v1159_v24 = vadd.f32 -1.0, %v1277_v17  ;;  %v795_v51 = vsel %vm770_vm14, %v765_v56, %v1157_v14  ;;  %v799_v25 = vmul.f32 %v794_v21, %v1541_v1  ;;  %v1069_v14 = vadd.f32 %v1061_v46, %v1057_v5  ;;  %v1064_v17 = vld [vmem:[%s1832_s4 + $0x18] sm:$0xff] }
 0x45e   :  { %v796_v4 = vsel %vm771_vm15, %v766_v52, %v1158_v19  ;;  %v800_v30 = vmul.f32 %v795_v51, %v1552_v15  ;;  %v805_v8 = vmul.f32 %v804_v10, %v798_v22  ;;  %v1077_v0 = vadd.f32 %v1065_v7, %v1061_v46  ;;  %v1068_v19 = vld [vmem:[%s1830_s2 + $0x18] sm:$0xff]  ;;  %v1063_v51 = vld [vmem:[%s1832_s4 + $0x10] sm:$0xff] }
 0x45f   :  { %v797_v18 = vsel %vm772_vm1, %v767_v58, %v1159_v24  ;;  %v801_v36 = vmul.f32 %v796_v4, %v1564_v23  ;;  %v806_v3 = vmul.f32 %v804_v10, %v799_v25  ;;  %v1059_v24 = vld [vmem:[%s1831_s3 + $0x10] sm:$0xff] }
 0x460   :  { %v802_v28 = vmul.f32 %v797_v18, %v1569_v27  ;;  %v807_v57 = vmul.f32 %v804_v10, %v800_v30  ;;  %v812_v35 = vadd.f32 %v811_v49, %v805_v8  ;;  %v1067_v25 = vld [vmem:[%s1830_s2 + $0x10] sm:$0xff] }
 0x461   :  { %v808_v26 = vmul.f32 %v804_v10, %v801_v36  ;;  %v813_v6 = vadd.f32 %v811_v49, %v806_v3  ;;  %v1080_v36 = vadd.f32 %v1068_v19, %v1064_v17 }
 0x462   :  { %v809_v33 = vmul.f32 %v804_v10, %v802_v28  ;;  %v1162_v38 = vmul.f32 -1.442695, %v812_v35  ;;  %v814_v39 = vadd.f32 %v811_v49, %v807_v57  ;;  %v1078_v10 = vadd.f32 %v1066_v43, %v1062_v2 }
 0x463   :  { %v1163_v31 = vmul.f32 -1.442695, %v813_v6  ;;  %v815_v1 = vadd.f32 %v811_v49, %v808_v26  ;;  %v1071_v35 = vadd.f32 %v1063_v51, %v1059_v24  ;;  %v1079_v26 = vadd.f32 %v1067_v25, %v1063_v51 }
 0x464   :  { %v816_v42 = vadd.f32 %v811_v49, %v809_v33  ;;  %1278 = vpow2.f32 %v1162_v38  ;;  %v1164_v29 = vmul.f32 -1.442695, %v814_v39  ;;  %v1060_v49 = vld [vmem:[%s1831_s3 + $0x18] sm:$0xff] }
 0x465   :  { %1280 = vpow2.f32 %v1163_v31  ;;  %v1165_v15 = vmul.f32 -1.442695, %v815_v1  ;;  %v1072_v18 = vadd.f32 %v1064_v17, %v1060_v49 }
 0x466   :  { %v1166_v45 = vmul.f32 -1.442695, %v816_v42  ;;  %1282 = vpow2.f32 %v1164_v29 }
 0x467   :  { %1284 = vpow2.f32 %v1165_v15 }
 0x468   :  { %1286 = vpow2.f32 %v1166_v45 }
 0x46e   :  { %v1279_v23 = vpop.eup %1278 }
 0x46f   :  { %v1281_v27 = vpop.eup %1280  ;;  %v832_v47 = vadd.f32 1.0, %v1279_v23 }
 0x470   :  { %v1283_v20 = vpop.eup %1282  ;;  %v833_v48 = vadd.f32 1.0, %v1281_v27 }
 0x471   :  { %v1285_v50 = vpop.eup %1284  ;;  %1288 = vrcp.f32 %v832_v47  ;;  %v834_v12 = vadd.f32 1.0, %v1283_v20 }
 0x472   :  { %1290 = vrcp.f32 %v833_v48  ;;  %v835_v32 = vadd.f32 1.0, %v1285_v50  ;;  %v1287_v54 = vpop.eup %1286 }
 0x473   :  { %1292 = vrcp.f32 %v834_v12  ;;  %v836_v11 = vadd.f32 1.0, %v1287_v54 }
 0x474   :  { %1294 = vrcp.f32 %v835_v32 }
 0x475   :  { %1296 = vrcp.f32 %v836_v11 }
 0x47b   :  { %v1289_v55 = vpop.eup %1288 }
 0x47c   :  { %v1291_v34 = vpop.eup %1290 }
 0x47d   :  { %v1293_v9 = vpop.eup %1292  ;;  %v1225_v16 = vpack.c.bf16 %v1291_v34, %v1289_v55 }
 0x47e   :  { %v1295_v56 = vpop.eup %1294 }
 0x47f   :  { %1226 = vmatprep.subr.bf16.mxu0 %v1225_v16  ;;  %v1229_v52 = vpack.c.bf16 %v1295_v56, %v1293_v9  ;;  %v1297_v58 = vpop.eup %1296 }
 0x480   :  { %1228 = vmatpush3.bf16.msra.mxu0 %v1225_v16 }
 0x481   :  { %1230 = vmatprep.subr.bf16.mxu0 %v1229_v52 }
 0x484   :  { %1232 = vmatpush3.bf16.msra.mxu0 %v1229_v52 }
 0x485   :  { %1205 = vmatprep.subr.msk.mxu0 %vm864_vm2, %v1297_v58 }
 0x488   :  { %1206 = vmatpush3.msk.msra.mxu0 %vm864_vm2, %v1297_v58 }
 0x489   :  { %1208 = vmatmul.mubr.msk.f32.vlgmr.msra.gmra.mrb[0].mxu0 %vm851_vm11, %v848_v37 }
 0x48a   :  { %1210 = vmatprep.mubr.msk.f32.mxu0 %vm851_vm11, %v849_v53 }
 0x48d   :  { %1211 = vmatmul.mubr.msk.f32.gmra.mrb[2].mxu0 %vm851_vm11, %v850_v59 }
 0x55c   :  { %v1209_v60 = vpop.f32.mrb[0].mxu0 }
 0x55d   :  { %v934_v61 = vpop.f32.mrb[1].mxu0 }
 0x55e   :  { %1219 = vmatprep.mubr.msk.f32.mxu1 %vm297_vm0, %v934_v61 }
 0x55f   :  { %1220 = vmatmul.mubr.msk.f32.vlgmr.msra.gmra.mrb[0].mxu1 %vm297_vm0, %v1209_v60 }
 0x560   :  { %v1212_v62 = vpop.f32.mrb[2].mxu0 }
 0x561   :  { %v944_v41 = vpop.f32.mrb[3].mxu0 }
 0x562   :  { %1222 = vmatprep.mubr.msk.f32.mxu1 %vm297_vm0, %v944_v41 }
 0x563   :  { %1223 = vmatmul.mubr.msk.f32.gmra.mrb[2].mxu1 %vm297_vm0, %v1212_v62  ;;  %vm1117_vm0 = vcmask 130048  }
 0x632   :  { %v1221_v13 = vpop.f32.mrb[0].mxu1 }
 0x633   :  { %v1082_v21 = vsub.f32 1.0, %v1221_v13  ;;  %v1038_v22 = vpop.f32.mrb[1].mxu1  ;;  %v1074_v30 = vmul.f32 %v1221_v13, %v1070_v44 }
 0x634   :  { %v1081_v4 = vsub.f32 1.0, %v1038_v22  ;;  %v1073_v3 = vmul.f32 %v1069_v14, %v1038_v22 }
 0x635   :  { %v1086_v8 = vmul.f32 %v1082_v21, %v1078_v10 }
 0x636   :  { %v1085_v28 = vmul.f32 %v1081_v4, %v1077_v0  ;;  %v1224_v57 = vpop.f32.mrb[2].mxu1 }
 0x637   :  { %v1090_v6 = vadd.f32 %v1086_v8, %v1074_v30  ;;  %v1084_v33 = vsub.f32 1.0, %v1224_v57  ;;  %v1048_v38 = vpop.f32.mrb[3].mxu1  ;;  %v1076_v42 = vmul.f32 %v1224_v57, %v1072_v18 }
 0x638   :  { %v1089_v39 = vadd.f32 %v1085_v28, %v1073_v3  ;;  %v1083_v31 = vsub.f32 1.0, %v1048_v38  ;;  %v1075_v45 = vmul.f32 %v1071_v35, %v1048_v38 }
 0x639   :  { %v1178_v1 = vmul.f32 -1.442695, %v1090_v6  ;;  %v1088_v29 = vmul.f32 %v1084_v33, %v1080_v36 }
 0x63a   :  { %v1177_v15 = vmul.f32 -1.442695, %v1089_v39  ;;  %v1087_v23 = vmul.f32 %v1083_v31, %v1079_v26 }
 0x63b   :  { %1298 = vpow2.f32 %v1178_v1  ;;  %v1092_v27 = vadd.f32 %v1088_v29, %v1076_v42 }
 0x63c   :  { %1300 = vpow2.f32 %v1177_v15  ;;  %v1091_v47 = vadd.f32 %v1087_v23, %v1075_v45 }
 0x63d   :  { %v1180_v20 = vmul.f32 -1.442695, %v1092_v27 }
 0x63e   :  { %v1179_v48 = vmul.f32 -1.442695, %v1091_v47 }
 0x63f   :  { %1302 = vpow2.f32 %v1180_v20 }
 0x640   :  { %1304 = vpow2.f32 %v1179_v48 }
 0x645   :  { %v1299_v50 = vpop.eup %1298 }
 0x646   :  { %v1301_v12 = vpop.eup %1300  ;;  %v1106_v32 = vadd.f32 1.0, %v1299_v50 }
 0x647   :  { %v1105_v54 = vadd.f32 1.0, %v1301_v12 }
 0x648   :  { %1306 = vrcp.f32 %v1106_v32 }
 0x649   :  { %v1303_v11 = vpop.eup %1302  ;;  %1308 = vrcp.f32 %v1105_v54 }
 0x64a   :  { %v1305_v55 = vpop.eup %1304  ;;  %v1108_v34 = vadd.f32 1.0, %v1303_v11 }
 0x64b   :  { %v1107_v9 = vadd.f32 1.0, %v1305_v55 }
 0x64c   :  { %1310 = vrcp.f32 %v1108_v34 }
 0x64d   :  { %1312 = vrcp.f32 %v1107_v9 }
 0x652   :  { %v1307_v16 = vpop.eup %1306 }
 0x653   :  { %v1309_v56 = vpop.eup %1308  ;;  %1119 = vst.msk [vmem:[%s1836_s8 + $0x8] sm:$0xff] %vm1117_vm0, %v1307_v16 }
 0x654   :  { %1118 = vst.msk [vmem:[%s1836_s8] sm:$0xff] %vm1117_vm0, %v1309_v56 }
 0x656   :  { %v1311_v52 = vpop.eup %1310 }
 0x657   :  { %v1313_v58 = vpop.eup %1312  ;;  %1121 = vst.msk [vmem:[%s1836_s8 + $0x18] sm:$0xff] %vm1117_vm0, %v1311_v52 }
 0x658   :  { %1120 = vst.msk [vmem:[%s1836_s8 + $0x10] sm:$0xff] %vm1117_vm0, %v1313_v58 }
 0x659   :  { %1126 = vsyncpa [#allocation4], 1 }

</bundles_post_ra>
